<compile_context>
chip_gen: v7x
topology: tpu7x:2x2x1
jax: 0.10.0
libtpu: 0.0.40
codegen_flags: <defaults>
</compile_context>

<pallas_src>
import jax
import jax.numpy as jnp
from jax.experimental import pallas as pl
from jax.experimental.pallas import tpu as pltpu  # noqa: F401  (kept for TPU-specific extensions)

NIN = 21          # amino-acid one-hot size
HIDDEN = 32       # hidden_dim (small synthetic size)
NUM_LAYERS = 2    # stacked biLSTM layers
NOUT = 16         # output projection size
B = 2             # batch
T = 8             # sequence length

DIN_PAD = 2 * HIDDEN      # padded input feature width (one-hot zero-padded)
NOUT_PAD = 128            # lane-dense output width (sliced back to NOUT)
assert DIN_PAD >= NIN, "input one-hot must fit in the padded feature width"


# ----------------------------------------------------------------------------
# Fused Pallas kernel: all biLSTM layers + projection in one call (no grid)
# ----------------------------------------------------------------------------
def _make_skip_lstm_kernel(T_, B_, num_layers, H, nout_pad):
    """Ref order:  x (T*B, 2H), w_slab (L, 2H, 12H), b_slab (L, 1, 8H),
    wp_slab ((L+1)*2H, nout_pad), bp (1, nout_pad), out (T*B, nout_pad)."""
    G = 4 * H                 # gate width per direction
    BB = 2 * B_               # rows 0:B fwd, B:2B bwd
    twoH = 2 * H

    def kernel(x_ref, w_ref, b_ref, wp_ref, bp_ref, out_ref):
        # --- constant masks, hoisted once (whole kernel is one unrolled block)
        lane = jax.lax.broadcasted_iota(jnp.int32, (BB, G), 1)
        g_lane = jnp.logical_and(lane >= 2 * H, lane < 3 * H)        # tanh lanes
        pre_scale = jnp.where(g_lane, 1.0, 0.5).astype(jnp.float32)  # 0.5 -> sigmoid lanes
        row = jax.lax.broadcasted_iota(jnp.int32, (BB, twoH), 0)
        col = jax.lax.broadcasted_iota(jnp.int32, (BB, twoH), 1)
        pad_mask = jnp.where((row < B_) == (col < H), 1.0, 0.0).astype(jnp.float32)

        x = x_ref[...]                      # (T*B, 2H) time-major, zero-padded one-hot

        def bilstm_layer(x_in, l):
            wih = w_ref[l, :, 0:2 * G]          # (2H, 8H)  [fwd gates | bwd gates]
            whh = w_ref[l, :, 2 * G:3 * G]      # (2H, 4H)  block-diag [[whh_f],[whh_b]]
            bias = b_ref[l]                     # (1, 8H)   combined b_ih + b_hh

            # Hoisted input projection for all timesteps, both directions.
            gx = jnp.dot(x_in, wih, preferred_element_type=jnp.float32) + bias  # (T*B, 8H)

            # Pre-pack per-step gate inputs (independent of the recurrence).
            gx_steps = []
            for t in range(T_):
                gf = gx[t * B_:(t + 1) * B_, 0:G]                      # fwd, time t
                gb = gx[(T_ - 1 - t) * B_:(T_ - t) * B_, G:2 * G]      # bwd, time T-1-t
                gx_steps.append(jnp.concatenate([gf, gb], axis=0))     # (2B, 4H)

            h_pad = jnp.zeros((BB, twoH), jnp.float32)   # [[h_f | 0], [0 | h_b]]
            c = jnp.zeros((BB, H), jnp.float32)
            h_pads = []
            for t in range(T_):                           # fully unrolled recurrence
                gates = gx_steps[t] + jnp.dot(h_pad, whh,
                                              preferred_element_type=jnp.float32)
                th = jnp.tanh(gates * pre_scale)
                acts = jnp.where(g_lane, th, 0.5 * th + 0.5)   # sigmoid via tanh
                i_g = acts[:, 0:H]
                f_g = acts[:, H:2 * H]
                g_g = acts[:, 2 * H:3 * H]
                o_g = acts[:, 3 * H:4 * H]
                c = f_g * c + i_g * g_g
                h = o_g * jnp.tanh(c)                                   # (2B, H)
                h_pad = jnp.concatenate([h, h], axis=1) * pad_mask      # (2B, 2H)
                h_pads.append(h_pad)

            # Assemble the (T*B, 2H) time-major layer output in registers:
            # time t <- fwd state of step t  +  bwd state of step T-1-t
            # (the two padded halves are complementary, so a plain add works).
            blocks = [h_pads[t][0:B_, :] + h_pads[T_ - 1 - t][B_:BB, :]
                      for t in range(T_)]
            return jnp.concatenate(blocks, axis=0)

        hs = []
        cur = x
        for l in range(num_layers):
            cur = bilstm_layer(cur, l)
            hs.append(cur)

        # Projection over [one_hot | h_1 | ... | h_L] as a sum of row-block
        # matmuls into a lane-dense (T*B, nout_pad) accumulator; one dense store.
        acc = jnp.dot(x, wp_ref[0:twoH, :], preferred_element_type=jnp.float32)
        for l in range(num_layers):
            acc = acc + jnp.dot(hs[l], wp_ref[(l + 1) * twoH:(l + 2) * twoH, :],
                                preferred_element_type=jnp.float32)
        out_ref[...] = acc + bp_ref[...]

    return kernel


# ----------------------------------------------------------------------------
# Parameters: raw weights (for the reference) + one-time packed slabs
# ----------------------------------------------------------------------------
def init_params(key):
    params = {"layers": []}
    dim = NIN
    scale = 1.0 / jnp.sqrt(HIDDEN)
    for _ in range(NUM_LAYERS):
        layer = {}
        for d in ("f", "b"):
            key, k1, k2, k3 = jax.random.split(key, 4)
            layer[f"w_ih_{d}"] = scale * jax.random.normal(k1, (dim, 4 * HIDDEN), jnp.float32)
            layer[f"w_hh_{d}"] = scale * jax.random.normal(k2, (HIDDEN, 4 * HIDDEN), jnp.float32)
            # combined b_ih + b_hh of the PyTorch LSTM
            layer[f"b_{d}"] = scale * jax.random.normal(k3, (1, 4 * HIDDEN), jnp.float32)
        params["layers"].append(layer)
        dim = 2 * HIDDEN  # bidirectional
    nfeat = NIN + 2 * HIDDEN * NUM_LAYERS
    key, k1, k2 = jax.random.split(key, 3)
    params["w_proj"] = (1.0 / jnp.sqrt(nfeat)) * jax.random.normal(k1, (nfeat, NOUT), jnp.float32)
    params["b_proj"] = (1.0 / jnp.sqrt(nfeat)) * jax.random.normal(k2, (1, NOUT), jnp.float32)
    return params


def pack_params(params):
    """Pack all weights once into lane-aligned kernel slabs (done outside jit)."""
    H, L = HIDDEN, NUM_LAYERS
    w_slab = jnp.zeros((L, 2 * H, 12 * H), jnp.float32)   # [wih_cat | whh block-diag]
    b_slab = jnp.zeros((L, 1, 8 * H), jnp.float32)
    for l, layer in enumerate(params["layers"]):
        din = layer["w_ih_f"].shape[0]
        wih_cat = jnp.concatenate([layer["w_ih_f"], layer["w_ih_b"]], axis=1)   # (din, 8H)
        w_slab = w_slab.at[l, :din, 0:8 * H].set(wih_cat)
        w_slab = w_slab.at[l, 0:H, 8 * H:12 * H].set(layer["w_hh_f"])
        w_slab = w_slab.at[l, H:2 * H, 8 * H:12 * H].set(layer["w_hh_b"])
        b_slab = b_slab.at[l, 0, :].set(
            jnp.concatenate([layer["b_f"], layer["b_b"]], axis=1)[0])

    # Projection weights, split into row blocks matching [one_hot_pad | h_1 | h_2],
    # rows zero-padded to 2H each and lanes padded to NOUT_PAD.
    wp = params["w_proj"]
    wp_slab = jnp.zeros(((L + 1) * 2 * H, NOUT_PAD), jnp.float32)
    wp_slab = wp_slab.at[:NIN, :NOUT].set(wp[:NIN])
    off = NIN
    for l in range(L):
        wp_slab = wp_slab.at[(l + 1) * 2 * H:(l + 2) * 2 * H, :NOUT].set(wp[off:off + 2 * H])
        off += 2 * H
    bp_pad = jnp.zeros((1, NOUT_PAD), jnp.float32).at[:, :NOUT].set(params["b_proj"])
    return {"w_slab": w_slab, "b_slab": b_slab, "wp_slab": wp_slab, "bp_pad": bp_pad}


# ----------------------------------------------------------------------------
# SkipLSTM forward (wrapper = glue only)
# ----------------------------------------------------------------------------
@jax.jit
def skip_lstm_forward(x_ids, packed):
    """x_ids: (B, T) int32 amino-acid indices.  Returns (B, T, NOUT)."""
    Bn, Tn = x_ids.shape
    # One-hot directly into the padded feature width (ids < NIN, extra lanes are 0).
    one_hot = jax.nn.one_hot(x_ids, DIN_PAD, dtype=jnp.float32)            # (B, T, 2H)
    x_flat = jnp.transpose(one_hot, (1, 0, 2)).reshape(Tn * Bn, DIN_PAD)   # time-major flat

    kernel = _make_skip_lstm_kernel(Tn, Bn, NUM_LAYERS, HIDDEN, NOUT_PAD)
    z = pl.pallas_call(
        kernel,
        out_shape=jax.ShapeDtypeStruct((Tn * Bn, NOUT_PAD), jnp.float32),
    )(x_flat, packed["w_slab"], packed["b_slab"], packed["wp_slab"], packed["bp_pad"])
    return z[:, :NOUT].reshape(Tn, Bn, NOUT).transpose(1, 0, 2)            # (B, T, NOUT)


# ----------------------------------------------------------------------------
# Pure-JAX reference (for correctness check)
# ----------------------------------------------------------------------------
def _ref_lstm_direction(x_tbd, w_ih, w_hh, b, reverse):
    H = w_hh.shape[0]
    xs = x_tbd[::-1] if reverse else x_tbd

    def step(carry, x_t):
        h, c = carry
        g = x_t @ w_ih + h @ w_hh + b[0]
        i = jax.nn.sigmoid(g[:, :H])
        f = jax.nn.sigmoid(g[:, H:2 * H])
        gg = jnp.tanh(g[:, 2 * H:3 * H])
        o = jax.nn.sigmoid(g[:, 3 * H:])
        c = f * c + i * gg
        h = o * jnp.tanh(c)
        return (h, c), h

    Bn = x_tbd.shape[1]
    init = (jnp.zeros((Bn, H), jnp.float32), jnp.zeros((Bn, H), jnp.float32))
    _, hs = jax.lax.scan(step, init, xs)
    return hs[::-1] if reverse else hs


def ref_forward(x_ids, params):
    one_hot = jax.nn.one_hot(x_ids, NIN, dtype=jnp.float32)
    h_tbd = jnp.transpose(one_hot, (1, 0, 2))
    hs = [h_tbd]
    cur = h_tbd
    for layer in params["layers"]:
        hf = _ref_lstm_direction(cur, layer["w_ih_f"], layer["w_hh_f"], layer["b_f"], False)
        hb = _ref_lstm_direction(cur, layer["w_ih_b"], layer["w_hh_b"], layer["b_b"], True)
        cur = jnp.concatenate([hf, hb], axis=-1)
        hs.append(cur)
    h_all = jnp.concatenate(hs, axis=-1)
    Tn, Bn, F = h_all.shape
    z = h_all.reshape(Tn * Bn, F) @ params["w_proj"] + params["b_proj"][0]
    return z.reshape(Tn, Bn, NOUT).transpose(1, 0, 2)


# ----------------------------------------------------------------------------
if __name__ == "__main__":
    key = jax.random.PRNGKey(0)
    key, kx, kp = jax.random.split(key, 3)
    x_ids = jax.random.randint(kx, (B, T), 0, NIN, dtype=jnp.int32)
    params = init_params(kp)
    packed = pack_params(params)          # one-time weight packing (not per call)

    out = skip_lstm_forward(x_ids, packed)
    out = jax.block_until_ready(out)
    assert out.shape == (B, T, NOUT), out.shape

    ref = jax.block_until_ready(ref_forward(x_ids, params))
    assert jnp.allclose(out, ref, atol=1e-4, rtol=1e-4), float(jnp.max(jnp.abs(out - ref)))

    print("KERNEL_OK")
</pallas_src>

<mosaic_0001>
module attributes {stable_mosaic.version = 11 : i64} {
  func.func @kernel(%arg0: memref<16x64xf32, #tpu.memory_space<vmem>>, %arg1: memref<2x64x384xf32, #tpu.memory_space<vmem>>, %arg2: memref<2x1x256xf32, #tpu.memory_space<vmem>>, %arg3: memref<192x128xf32, #tpu.memory_space<vmem>>, %arg4: memref<1x128xf32, #tpu.memory_space<vmem>>, %arg5: memref<16x128xf32, #tpu.memory_space<vmem>>) attributes {dimension_semantics = [], scalar_prefetch = 0 : i64, scratch_operands = 0 : i64, tpu.core_type = #tpu.core_type<tc>} {
    %0 = tpu.iota {dimensions = array<i32: 1>} : vector<4x128xi32>
    %c64_i32 = arith.constant 64 : i32
    %1 = vector.broadcast %c64_i32 : i32 to vector<4x128xi32>
    %2 = arith.cmpi sge, %0, %1 : vector<4x128xi32>
    %c96_i32 = arith.constant 96 : i32
    %3 = vector.broadcast %c96_i32 : i32 to vector<4x128xi32>
    %4 = arith.cmpi slt, %0, %3 : vector<4x128xi32>
    %5 = arith.andi %2, %4 : vector<4x128xi1>
    %cst = arith.constant 1.000000e+00 : f32
    %cst_0 = arith.constant 5.000000e-01 : f32
    %6 = vector.broadcast %cst : f32 to vector<4x128xf32>
    %7 = vector.broadcast %cst_0 : f32 to vector<4x128xf32>
    %8 = arith.select %5, %6, %7 : vector<4x128xi1>, vector<4x128xf32>
    %9 = tpu.iota {dimensions = array<i32: 0>} : vector<4x64xi32>
    %10 = tpu.iota {dimensions = array<i32: 1>} : vector<4x64xi32>
    %c2_i32 = arith.constant 2 : i32
    %11 = vector.broadcast %c2_i32 : i32 to vector<4x64xi32>
    %12 = arith.cmpi slt, %9, %11 : vector<4x64xi32>
    %c32_i32 = arith.constant 32 : i32
    %13 = vector.broadcast %c32_i32 : i32 to vector<4x64xi32>
    %14 = arith.cmpi slt, %10, %13 : vector<4x64xi32>
    %15 = arith.xori %12, %14 : vector<4x64xi1>
    %cst_1 = arith.constant dense<true> : vector<4x64xi1>
    %16 = arith.xori %15, %cst_1 : vector<4x64xi1>
    %cst_2 = arith.constant 1.000000e+00 : f32
    %cst_3 = arith.constant 0.000000e+00 : f32
    %17 = vector.broadcast %cst_2 : f32 to vector<4x64xf32>
    %18 = vector.broadcast %cst_3 : f32 to vector<4x64xf32>
    %19 = arith.select %16, %17, %18 : vector<4x64xi1>, vector<4x64xf32>
    %c0 = arith.constant 0 : index
    %c0_4 = arith.constant 0 : index
    %20 = vector.load %arg0[%c0, %c0_4] : memref<16x64xf32, #tpu.memory_space<vmem>>, vector<16x64xf32>
    %c0_5 = arith.constant 0 : index
    %c0_6 = arith.constant 0 : index
    %c0_7 = arith.constant 0 : index
    %21 = vector.load %arg1[%c0_5, %c0_6, %c0_7] : memref<2x64x384xf32, #tpu.memory_space<vmem>>, vector<1x64x256xf32>
    %22 = vector.shape_cast %21 : vector<1x64x256xf32> to vector<64x256xf32>
    %c0_8 = arith.constant 0 : index
    %c0_9 = arith.constant 0 : index
    %c256 = arith.constant 256 : index
    %23 = vector.load %arg1[%c0_8, %c0_9, %c256] : memref<2x64x384xf32, #tpu.memory_space<vmem>>, vector<1x64x128xf32>
    %24 = vector.shape_cast %23 : vector<1x64x128xf32> to vector<64x128xf32>
    %c0_10 = arith.constant 0 : index
    %c0_11 = arith.constant 0 : index
    %c0_12 = arith.constant 0 : index
    %25 = vector.load %arg2[%c0_10, %c0_11, %c0_12] : memref<2x1x256xf32, #tpu.memory_space<vmem>>, vector<1x1x256xf32>
    %26 = vector.shape_cast %25 : vector<1x1x256xf32> to vector<1x256xf32>
    %cst_13 = arith.constant dense<0.000000e+00> : vector<16x256xf32>
    %27 = tpu.matmul %20, %22, %cst_13 {dimension_numbers = #tpu.dot_dimension_numbers<[1], [0], [0], [1], [0, 0, 1, 1], [], []>} : vector<16x64xf32>, vector<64x256xf32>, vector<16x256xf32> -> vector<16x256xf32>
    %28 = vector.broadcast %26 : vector<1x256xf32> to vector<16x256xf32>
    %29 = arith.addf %27, %28 : vector<16x256xf32>
    %30 = vector.extract_strided_slice %29 {offsets = [0, 0], sizes = [2, 128], strides = [1, 1]} : vector<16x256xf32> to vector<2x128xf32>
    %31 = vector.extract_strided_slice %29 {offsets = [14, 128], sizes = [2, 128], strides = [1, 1]} : vector<16x256xf32> to vector<2x128xf32>
    %32 = tpu.concatenate %30, %31 in 0 : vector<2x128xf32>, vector<2x128xf32> -> vector<4x128xf32>
    %33 = vector.extract_strided_slice %29 {offsets = [2, 0], sizes = [2, 128], strides = [1, 1]} : vector<16x256xf32> to vector<2x128xf32>
    %34 = vector.extract_strided_slice %29 {offsets = [12, 128], sizes = [2, 128], strides = [1, 1]} : vector<16x256xf32> to vector<2x128xf32>
    %35 = tpu.concatenate %33, %34 in 0 : vector<2x128xf32>, vector<2x128xf32> -> vector<4x128xf32>
    %36 = vector.extract_strided_slice %29 {offsets = [4, 0], sizes = [2, 128], strides = [1, 1]} : vector<16x256xf32> to vector<2x128xf32>
    %37 = vector.extract_strided_slice %29 {offsets = [10, 128], sizes = [2, 128], strides = [1, 1]} : vector<16x256xf32> to vector<2x128xf32>
    %38 = tpu.concatenate %36, %37 in 0 : vector<2x128xf32>, vector<2x128xf32> -> vector<4x128xf32>
    %39 = vector.extract_strided_slice %29 {offsets = [6, 0], sizes = [2, 128], strides = [1, 1]} : vector<16x256xf32> to vector<2x128xf32>
    %40 = vector.extract_strided_slice %29 {offsets = [8, 128], sizes = [2, 128], strides = [1, 1]} : vector<16x256xf32> to vector<2x128xf32>
    %41 = tpu.concatenate %39, %40 in 0 : vector<2x128xf32>, vector<2x128xf32> -> vector<4x128xf32>
    %42 = vector.extract_strided_slice %29 {offsets = [8, 0], sizes = [2, 128], strides = [1, 1]} : vector<16x256xf32> to vector<2x128xf32>
    %43 = vector.extract_strided_slice %29 {offsets = [6, 128], sizes = [2, 128], strides = [1, 1]} : vector<16x256xf32> to vector<2x128xf32>
    %44 = tpu.concatenate %42, %43 in 0 : vector<2x128xf32>, vector<2x128xf32> -> vector<4x128xf32>
    %45 = vector.extract_strided_slice %29 {offsets = [10, 0], sizes = [2, 128], strides = [1, 1]} : vector<16x256xf32> to vector<2x128xf32>
    %46 = vector.extract_strided_slice %29 {offsets = [4, 128], sizes = [2, 128], strides = [1, 1]} : vector<16x256xf32> to vector<2x128xf32>
    %47 = tpu.concatenate %45, %46 in 0 : vector<2x128xf32>, vector<2x128xf32> -> vector<4x128xf32>
    %48 = vector.extract_strided_slice %29 {offsets = [12, 0], sizes = [2, 128], strides = [1, 1]} : vector<16x256xf32> to vector<2x128xf32>
    %49 = vector.extract_strided_slice %29 {offsets = [2, 128], sizes = [2, 128], strides = [1, 1]} : vector<16x256xf32> to vector<2x128xf32>
    %50 = tpu.concatenate %48, %49 in 0 : vector<2x128xf32>, vector<2x128xf32> -> vector<4x128xf32>
    %51 = vector.extract_strided_slice %29 {offsets = [14, 0], sizes = [2, 128], strides = [1, 1]} : vector<16x256xf32> to vector<2x128xf32>
    %52 = vector.extract_strided_slice %29 {offsets = [0, 128], sizes = [2, 128], strides = [1, 1]} : vector<16x256xf32> to vector<2x128xf32>
    %53 = tpu.concatenate %51, %52 in 0 : vector<2x128xf32>, vector<2x128xf32> -> vector<4x128xf32>
    %cst_14 = arith.constant 0.000000e+00 : f32
    %54 = vector.broadcast %cst_14 : f32 to vector<4x64xf32>
    %cst_15 = arith.constant 0.000000e+00 : f32
    %55 = vector.broadcast %cst_15 : f32 to vector<4x32xf32>
    %cst_16 = arith.constant dense<0.000000e+00> : vector<4x128xf32>
    %56 = tpu.matmul %54, %24, %cst_16 {dimension_numbers = #tpu.dot_dimension_numbers<[1], [0], [0], [1], [0, 0, 1, 1], [], []>} : vector<4x64xf32>, vector<64x128xf32>, vector<4x128xf32> -> vector<4x128xf32>
    %57 = arith.addf %32, %56 : vector<4x128xf32>
    %58 = arith.mulf %57, %8 : vector<4x128xf32>
    %59 = math.tanh %58 : vector<4x128xf32>
    %cst_17 = arith.constant 5.000000e-01 : f32
    %60 = vector.broadcast %cst_17 : f32 to vector<4x128xf32>
    %61 = arith.mulf %60, %59 : vector<4x128xf32>
    %cst_18 = arith.constant 5.000000e-01 : f32
    %62 = vector.broadcast %cst_18 : f32 to vector<4x128xf32>
    %63 = arith.addf %61, %62 : vector<4x128xf32>
    %64 = arith.select %5, %59, %63 : vector<4x128xi1>, vector<4x128xf32>
    %65 = vector.extract_strided_slice %64 {offsets = [0, 0], sizes = [4, 32], strides = [1, 1]} : vector<4x128xf32> to vector<4x32xf32>
    %66 = vector.extract_strided_slice %64 {offsets = [0, 32], sizes = [4, 32], strides = [1, 1]} : vector<4x128xf32> to vector<4x32xf32>
    %67 = vector.extract_strided_slice %64 {offsets = [0, 64], sizes = [4, 32], strides = [1, 1]} : vector<4x128xf32> to vector<4x32xf32>
    %68 = vector.extract_strided_slice %64 {offsets = [0, 96], sizes = [4, 32], strides = [1, 1]} : vector<4x128xf32> to vector<4x32xf32>
    %69 = arith.mulf %66, %55 : vector<4x32xf32>
    %70 = arith.mulf %65, %67 : vector<4x32xf32>
    %71 = arith.addf %69, %70 : vector<4x32xf32>
    %72 = math.tanh %71 : vector<4x32xf32>
    %73 = arith.mulf %68, %72 : vector<4x32xf32>
    %74 = tpu.concatenate %73, %73 in 1 : vector<4x32xf32>, vector<4x32xf32> -> vector<4x64xf32>
    %75 = arith.mulf %74, %19 : vector<4x64xf32>
    %cst_19 = arith.constant dense<0.000000e+00> : vector<4x128xf32>
    %76 = tpu.matmul %75, %24, %cst_19 {dimension_numbers = #tpu.dot_dimension_numbers<[1], [0], [0], [1], [0, 0, 1, 1], [], []>} : vector<4x64xf32>, vector<64x128xf32>, vector<4x128xf32> -> vector<4x128xf32>
    %77 = arith.addf %35, %76 : vector<4x128xf32>
    %78 = arith.mulf %77, %8 : vector<4x128xf32>
    %79 = math.tanh %78 : vector<4x128xf32>
    %cst_20 = arith.constant 5.000000e-01 : f32
    %80 = vector.broadcast %cst_20 : f32 to vector<4x128xf32>
    %81 = arith.mulf %80, %79 : vector<4x128xf32>
    %cst_21 = arith.constant 5.000000e-01 : f32
    %82 = vector.broadcast %cst_21 : f32 to vector<4x128xf32>
    %83 = arith.addf %81, %82 : vector<4x128xf32>
    %84 = arith.select %5, %79, %83 : vector<4x128xi1>, vector<4x128xf32>
    %85 = vector.extract_strided_slice %84 {offsets = [0, 0], sizes = [4, 32], strides = [1, 1]} : vector<4x128xf32> to vector<4x32xf32>
    %86 = vector.extract_strided_slice %84 {offsets = [0, 32], sizes = [4, 32], strides = [1, 1]} : vector<4x128xf32> to vector<4x32xf32>
    %87 = vector.extract_strided_slice %84 {offsets = [0, 64], sizes = [4, 32], strides = [1, 1]} : vector<4x128xf32> to vector<4x32xf32>
    %88 = vector.extract_strided_slice %84 {offsets = [0, 96], sizes = [4, 32], strides = [1, 1]} : vector<4x128xf32> to vector<4x32xf32>
    %89 = arith.mulf %86, %71 : vector<4x32xf32>
    %90 = arith.mulf %85, %87 : vector<4x32xf32>
    %91 = arith.addf %89, %90 : vector<4x32xf32>
    %92 = math.tanh %91 : vector<4x32xf32>
    %93 = arith.mulf %88, %92 : vector<4x32xf32>
    %94 = tpu.concatenate %93, %93 in 1 : vector<4x32xf32>, vector<4x32xf32> -> vector<4x64xf32>
    %95 = arith.mulf %94, %19 : vector<4x64xf32>
    %cst_22 = arith.constant dense<0.000000e+00> : vector<4x128xf32>
    %96 = tpu.matmul %95, %24, %cst_22 {dimension_numbers = #tpu.dot_dimension_numbers<[1], [0], [0], [1], [0, 0, 1, 1], [], []>} : vector<4x64xf32>, vector<64x128xf32>, vector<4x128xf32> -> vector<4x128xf32>
    %97 = arith.addf %38, %96 : vector<4x128xf32>
    %98 = arith.mulf %97, %8 : vector<4x128xf32>
    %99 = math.tanh %98 : vector<4x128xf32>
    %cst_23 = arith.constant 5.000000e-01 : f32
    %100 = vector.broadcast %cst_23 : f32 to vector<4x128xf32>
    %101 = arith.mulf %100, %99 : vector<4x128xf32>
    %cst_24 = arith.constant 5.000000e-01 : f32
    %102 = vector.broadcast %cst_24 : f32 to vector<4x128xf32>
    %103 = arith.addf %101, %102 : vector<4x128xf32>
    %104 = arith.select %5, %99, %103 : vector<4x128xi1>, vector<4x128xf32>
    %105 = vector.extract_strided_slice %104 {offsets = [0, 0], sizes = [4, 32], strides = [1, 1]} : vector<4x128xf32> to vector<4x32xf32>
    %106 = vector.extract_strided_slice %104 {offsets = [0, 32], sizes = [4, 32], strides = [1, 1]} : vector<4x128xf32> to vector<4x32xf32>
    %107 = vector.extract_strided_slice %104 {offsets = [0, 64], sizes = [4, 32], strides = [1, 1]} : vector<4x128xf32> to vector<4x32xf32>
    %108 = vector.extract_strided_slice %104 {offsets = [0, 96], sizes = [4, 32], strides = [1, 1]} : vector<4x128xf32> to vector<4x32xf32>
    %109 = arith.mulf %106, %91 : vector<4x32xf32>
    %110 = arith.mulf %105, %107 : vector<4x32xf32>
    %111 = arith.addf %109, %110 : vector<4x32xf32>
    %112 = math.tanh %111 : vector<4x32xf32>
    %113 = arith.mulf %108, %112 : vector<4x32xf32>
    %114 = tpu.concatenate %113, %113 in 1 : vector<4x32xf32>, vector<4x32xf32> -> vector<4x64xf32>
    %115 = arith.mulf %114, %19 : vector<4x64xf32>
    %cst_25 = arith.constant dense<0.000000e+00> : vector<4x128xf32>
    %116 = tpu.matmul %115, %24, %cst_25 {dimension_numbers = #tpu.dot_dimension_numbers<[1], [0], [0], [1], [0, 0, 1, 1], [], []>} : vector<4x64xf32>, vector<64x128xf32>, vector<4x128xf32> -> vector<4x128xf32>
    %117 = arith.addf %41, %116 : vector<4x128xf32>
    %118 = arith.mulf %117, %8 : vector<4x128xf32>
    %119 = math.tanh %118 : vector<4x128xf32>
    %cst_26 = arith.constant 5.000000e-01 : f32
    %120 = vector.broadcast %cst_26 : f32 to vector<4x128xf32>
    %121 = arith.mulf %120, %119 : vector<4x128xf32>
    %cst_27 = arith.constant 5.000000e-01 : f32
    %122 = vector.broadcast %cst_27 : f32 to vector<4x128xf32>
    %123 = arith.addf %121, %122 : vector<4x128xf32>
    %124 = arith.select %5, %119, %123 : vector<4x128xi1>, vector<4x128xf32>
    %125 = vector.extract_strided_slice %124 {offsets = [0, 0], sizes = [4, 32], strides = [1, 1]} : vector<4x128xf32> to vector<4x32xf32>
    %126 = vector.extract_strided_slice %124 {offsets = [0, 32], sizes = [4, 32], strides = [1, 1]} : vector<4x128xf32> to vector<4x32xf32>
    %127 = vector.extract_strided_slice %124 {offsets = [0, 64], sizes = [4, 32], strides = [1, 1]} : vector<4x128xf32> to vector<4x32xf32>
    %128 = vector.extract_strided_slice %124 {offsets = [0, 96], sizes = [4, 32], strides = [1, 1]} : vector<4x128xf32> to vector<4x32xf32>
    %129 = arith.mulf %126, %111 : vector<4x32xf32>
    %130 = arith.mulf %125, %127 : vector<4x32xf32>
    %131 = arith.addf %129, %130 : vector<4x32xf32>
    %132 = math.tanh %131 : vector<4x32xf32>
    %133 = arith.mulf %128, %132 : vector<4x32xf32>
    %134 = tpu.concatenate %133, %133 in 1 : vector<4x32xf32>, vector<4x32xf32> -> vector<4x64xf32>
    %135 = arith.mulf %134, %19 : vector<4x64xf32>
    %cst_28 = arith.constant dense<0.000000e+00> : vector<4x128xf32>
    %136 = tpu.matmul %135, %24, %cst_28 {dimension_numbers = #tpu.dot_dimension_numbers<[1], [0], [0], [1], [0, 0, 1, 1], [], []>} : vector<4x64xf32>, vector<64x128xf32>, vector<4x128xf32> -> vector<4x128xf32>
    %137 = arith.addf %44, %136 : vector<4x128xf32>
    %138 = arith.mulf %137, %8 : vector<4x128xf32>
    %139 = math.tanh %138 : vector<4x128xf32>
    %cst_29 = arith.constant 5.000000e-01 : f32
    %140 = vector.broadcast %cst_29 : f32 to vector<4x128xf32>
    %141 = arith.mulf %140, %139 : vector<4x128xf32>
    %cst_30 = arith.constant 5.000000e-01 : f32
    %142 = vector.broadcast %cst_30 : f32 to vector<4x128xf32>
    %143 = arith.addf %141, %142 : vector<4x128xf32>
    %144 = arith.select %5, %139, %143 : vector<4x128xi1>, vector<4x128xf32>
    %145 = vector.extract_strided_slice %144 {offsets = [0, 0], sizes = [4, 32], strides = [1, 1]} : vector<4x128xf32> to vector<4x32xf32>
    %146 = vector.extract_strided_slice %144 {offsets = [0, 32], sizes = [4, 32], strides = [1, 1]} : vector<4x128xf32> to vector<4x32xf32>
    %147 = vector.extract_strided_slice %144 {offsets = [0, 64], sizes = [4, 32], strides = [1, 1]} : vector<4x128xf32> to vector<4x32xf32>
    %148 = vector.extract_strided_slice %144 {offsets = [0, 96], sizes = [4, 32], strides = [1, 1]} : vector<4x128xf32> to vector<4x32xf32>
    %149 = arith.mulf %146, %131 : vector<4x32xf32>
    %150 = arith.mulf %145, %147 : vector<4x32xf32>
    %151 = arith.addf %149, %150 : vector<4x32xf32>
    %152 = math.tanh %151 : vector<4x32xf32>
    %153 = arith.mulf %148, %152 : vector<4x32xf32>
    %154 = tpu.concatenate %153, %153 in 1 : vector<4x32xf32>, vector<4x32xf32> -> vector<4x64xf32>
    %155 = arith.mulf %154, %19 : vector<4x64xf32>
    %cst_31 = arith.constant dense<0.000000e+00> : vector<4x128xf32>
    %156 = tpu.matmul %155, %24, %cst_31 {dimension_numbers = #tpu.dot_dimension_numbers<[1], [0], [0], [1], [0, 0, 1, 1], [], []>} : vector<4x64xf32>, vector<64x128xf32>, vector<4x128xf32> -> vector<4x128xf32>
    %157 = arith.addf %47, %156 : vector<4x128xf32>
    %158 = arith.mulf %157, %8 : vector<4x128xf32>
    %159 = math.tanh %158 : vector<4x128xf32>
    %cst_32 = arith.constant 5.000000e-01 : f32
    %160 = vector.broadcast %cst_32 : f32 to vector<4x128xf32>
    %161 = arith.mulf %160, %159 : vector<4x128xf32>
    %cst_33 = arith.constant 5.000000e-01 : f32
    %162 = vector.broadcast %cst_33 : f32 to vector<4x128xf32>
    %163 = arith.addf %161, %162 : vector<4x128xf32>
    %164 = arith.select %5, %159, %163 : vector<4x128xi1>, vector<4x128xf32>
    %165 = vector.extract_strided_slice %164 {offsets = [0, 0], sizes = [4, 32], strides = [1, 1]} : vector<4x128xf32> to vector<4x32xf32>
    %166 = vector.extract_strided_slice %164 {offsets = [0, 32], sizes = [4, 32], strides = [1, 1]} : vector<4x128xf32> to vector<4x32xf32>
    %167 = vector.extract_strided_slice %164 {offsets = [0, 64], sizes = [4, 32], strides = [1, 1]} : vector<4x128xf32> to vector<4x32xf32>
    %168 = vector.extract_strided_slice %164 {offsets = [0, 96], sizes = [4, 32], strides = [1, 1]} : vector<4x128xf32> to vector<4x32xf32>
    %169 = arith.mulf %166, %151 : vector<4x32xf32>
    %170 = arith.mulf %165, %167 : vector<4x32xf32>
    %171 = arith.addf %169, %170 : vector<4x32xf32>
    %172 = math.tanh %171 : vector<4x32xf32>
    %173 = arith.mulf %168, %172 : vector<4x32xf32>
    %174 = tpu.concatenate %173, %173 in 1 : vector<4x32xf32>, vector<4x32xf32> -> vector<4x64xf32>
    %175 = arith.mulf %174, %19 : vector<4x64xf32>
    %cst_34 = arith.constant dense<0.000000e+00> : vector<4x128xf32>
    %176 = tpu.matmul %175, %24, %cst_34 {dimension_numbers = #tpu.dot_dimension_numbers<[1], [0], [0], [1], [0, 0, 1, 1], [], []>} : vector<4x64xf32>, vector<64x128xf32>, vector<4x128xf32> -> vector<4x128xf32>
    %177 = arith.addf %50, %176 : vector<4x128xf32>
    %178 = arith.mulf %177, %8 : vector<4x128xf32>
    %179 = math.tanh %178 : vector<4x128xf32>
    %cst_35 = arith.constant 5.000000e-01 : f32
    %180 = vector.broadcast %cst_35 : f32 to vector<4x128xf32>
    %181 = arith.mulf %180, %179 : vector<4x128xf32>
    %cst_36 = arith.constant 5.000000e-01 : f32
    %182 = vector.broadcast %cst_36 : f32 to vector<4x128xf32>
    %183 = arith.addf %181, %182 : vector<4x128xf32>
    %184 = arith.select %5, %179, %183 : vector<4x128xi1>, vector<4x128xf32>
    %185 = vector.extract_strided_slice %184 {offsets = [0, 0], sizes = [4, 32], strides = [1, 1]} : vector<4x128xf32> to vector<4x32xf32>
    %186 = vector.extract_strided_slice %184 {offsets = [0, 32], sizes = [4, 32], strides = [1, 1]} : vector<4x128xf32> to vector<4x32xf32>
    %187 = vector.extract_strided_slice %184 {offsets = [0, 64], sizes = [4, 32], strides = [1, 1]} : vector<4x128xf32> to vector<4x32xf32>
    %188 = vector.extract_strided_slice %184 {offsets = [0, 96], sizes = [4, 32], strides = [1, 1]} : vector<4x128xf32> to vector<4x32xf32>
    %189 = arith.mulf %186, %171 : vector<4x32xf32>
    %190 = arith.mulf %185, %187 : vector<4x32xf32>
    %191 = arith.addf %189, %190 : vector<4x32xf32>
    %192 = math.tanh %191 : vector<4x32xf32>
    %193 = arith.mulf %188, %192 : vector<4x32xf32>
    %194 = tpu.concatenate %193, %193 in 1 : vector<4x32xf32>, vector<4x32xf32> -> vector<4x64xf32>
    %195 = arith.mulf %194, %19 : vector<4x64xf32>
    %cst_37 = arith.constant dense<0.000000e+00> : vector<4x128xf32>
    %196 = tpu.matmul %195, %24, %cst_37 {dimension_numbers = #tpu.dot_dimension_numbers<[1], [0], [0], [1], [0, 0, 1, 1], [], []>} : vector<4x64xf32>, vector<64x128xf32>, vector<4x128xf32> -> vector<4x128xf32>
    %197 = arith.addf %53, %196 : vector<4x128xf32>
    %198 = arith.mulf %197, %8 : vector<4x128xf32>
    %199 = math.tanh %198 : vector<4x128xf32>
    %cst_38 = arith.constant 5.000000e-01 : f32
    %200 = vector.broadcast %cst_38 : f32 to vector<4x128xf32>
    %201 = arith.mulf %200, %199 : vector<4x128xf32>
    %cst_39 = arith.constant 5.000000e-01 : f32
    %202 = vector.broadcast %cst_39 : f32 to vector<4x128xf32>
    %203 = arith.addf %201, %202 : vector<4x128xf32>
    %204 = arith.select %5, %199, %203 : vector<4x128xi1>, vector<4x128xf32>
    %205 = vector.extract_strided_slice %204 {offsets = [0, 0], sizes = [4, 32], strides = [1, 1]} : vector<4x128xf32> to vector<4x32xf32>
    %206 = vector.extract_strided_slice %204 {offsets = [0, 32], sizes = [4, 32], strides = [1, 1]} : vector<4x128xf32> to vector<4x32xf32>
    %207 = vector.extract_strided_slice %204 {offsets = [0, 64], sizes = [4, 32], strides = [1, 1]} : vector<4x128xf32> to vector<4x32xf32>
    %208 = vector.extract_strided_slice %204 {offsets = [0, 96], sizes = [4, 32], strides = [1, 1]} : vector<4x128xf32> to vector<4x32xf32>
    %209 = arith.mulf %206, %191 : vector<4x32xf32>
    %210 = arith.mulf %205, %207 : vector<4x32xf32>
    %211 = arith.addf %209, %210 : vector<4x32xf32>
    %212 = math.tanh %211 : vector<4x32xf32>
    %213 = arith.mulf %208, %212 : vector<4x32xf32>
    %214 = tpu.concatenate %213, %213 in 1 : vector<4x32xf32>, vector<4x32xf32> -> vector<4x64xf32>
    %215 = arith.mulf %214, %19 : vector<4x64xf32>
    %216 = vector.extract_strided_slice %75 {offsets = [0, 0], sizes = [2, 64], strides = [1, 1]} : vector<4x64xf32> to vector<2x64xf32>
    %217 = vector.extract_strided_slice %215 {offsets = [2, 0], sizes = [2, 64], strides = [1, 1]} : vector<4x64xf32> to vector<2x64xf32>
    %218 = arith.addf %216, %217 : vector<2x64xf32>
    %219 = vector.extract_strided_slice %95 {offsets = [0, 0], sizes = [2, 64], strides = [1, 1]} : vector<4x64xf32> to vector<2x64xf32>
    %220 = vector.extract_strided_slice %195 {offsets = [2, 0], sizes = [2, 64], strides = [1, 1]} : vector<4x64xf32> to vector<2x64xf32>
    %221 = arith.addf %219, %220 : vector<2x64xf32>
    %222 = vector.extract_strided_slice %115 {offsets = [0, 0], sizes = [2, 64], strides = [1, 1]} : vector<4x64xf32> to vector<2x64xf32>
    %223 = vector.extract_strided_slice %175 {offsets = [2, 0], sizes = [2, 64], strides = [1, 1]} : vector<4x64xf32> to vector<2x64xf32>
    %224 = arith.addf %222, %223 : vector<2x64xf32>
    %225 = vector.extract_strided_slice %135 {offsets = [0, 0], sizes = [2, 64], strides = [1, 1]} : vector<4x64xf32> to vector<2x64xf32>
    %226 = vector.extract_strided_slice %155 {offsets = [2, 0], sizes = [2, 64], strides = [1, 1]} : vector<4x64xf32> to vector<2x64xf32>
    %227 = arith.addf %225, %226 : vector<2x64xf32>
    %228 = vector.extract_strided_slice %155 {offsets = [0, 0], sizes = [2, 64], strides = [1, 1]} : vector<4x64xf32> to vector<2x64xf32>
    %229 = vector.extract_strided_slice %135 {offsets = [2, 0], sizes = [2, 64], strides = [1, 1]} : vector<4x64xf32> to vector<2x64xf32>
    %230 = arith.addf %228, %229 : vector<2x64xf32>
    %231 = vector.extract_strided_slice %175 {offsets = [0, 0], sizes = [2, 64], strides = [1, 1]} : vector<4x64xf32> to vector<2x64xf32>
    %232 = vector.extract_strided_slice %115 {offsets = [2, 0], sizes = [2, 64], strides = [1, 1]} : vector<4x64xf32> to vector<2x64xf32>
    %233 = arith.addf %231, %232 : vector<2x64xf32>
    %234 = vector.extract_strided_slice %195 {offsets = [0, 0], sizes = [2, 64], strides = [1, 1]} : vector<4x64xf32> to vector<2x64xf32>
    %235 = vector.extract_strided_slice %95 {offsets = [2, 0], sizes = [2, 64], strides = [1, 1]} : vector<4x64xf32> to vector<2x64xf32>
    %236 = arith.addf %234, %235 : vector<2x64xf32>
    %237 = vector.extract_strided_slice %215 {offsets = [0, 0], sizes = [2, 64], strides = [1, 1]} : vector<4x64xf32> to vector<2x64xf32>
    %238 = vector.extract_strided_slice %75 {offsets = [2, 0], sizes = [2, 64], strides = [1, 1]} : vector<4x64xf32> to vector<2x64xf32>
    %239 = arith.addf %237, %238 : vector<2x64xf32>
    %240 = tpu.concatenate %218, %221, %224, %227, %230, %233, %236, %239 in 0 : vector<2x64xf32>, vector<2x64xf32>, vector<2x64xf32>, vector<2x64xf32>, vector<2x64xf32>, vector<2x64xf32>, vector<2x64xf32>, vector<2x64xf32> -> vector<16x64xf32>
    %c1 = arith.constant 1 : index
    %c0_40 = arith.constant 0 : index
    %c0_41 = arith.constant 0 : index
    %241 = vector.load %arg1[%c1, %c0_40, %c0_41] : memref<2x64x384xf32, #tpu.memory_space<vmem>>, vector<1x64x256xf32>
    %242 = vector.shape_cast %241 : vector<1x64x256xf32> to vector<64x256xf32>
    %c1_42 = arith.constant 1 : index
    %c0_43 = arith.constant 0 : index
    %c256_44 = arith.constant 256 : index
    %243 = vector.load %arg1[%c1_42, %c0_43, %c256_44] : memref<2x64x384xf32, #tpu.memory_space<vmem>>, vector<1x64x128xf32>
    %244 = vector.shape_cast %243 : vector<1x64x128xf32> to vector<64x128xf32>
    %c1_45 = arith.constant 1 : index
    %c0_46 = arith.constant 0 : index
    %c0_47 = arith.constant 0 : index
    %245 = vector.load %arg2[%c1_45, %c0_46, %c0_47] : memref<2x1x256xf32, #tpu.memory_space<vmem>>, vector<1x1x256xf32>
    %246 = vector.shape_cast %245 : vector<1x1x256xf32> to vector<1x256xf32>
    %cst_48 = arith.constant dense<0.000000e+00> : vector<16x256xf32>
    %247 = tpu.matmul %240, %242, %cst_48 {dimension_numbers = #tpu.dot_dimension_numbers<[1], [0], [0], [1], [0, 0, 1, 1], [], []>} : vector<16x64xf32>, vector<64x256xf32>, vector<16x256xf32> -> vector<16x256xf32>
    %248 = vector.broadcast %246 : vector<1x256xf32> to vector<16x256xf32>
    %249 = arith.addf %247, %248 : vector<16x256xf32>
    %250 = vector.extract_strided_slice %249 {offsets = [0, 0], sizes = [2, 128], strides = [1, 1]} : vector<16x256xf32> to vector<2x128xf32>
    %251 = vector.extract_strided_slice %249 {offsets = [14, 128], sizes = [2, 128], strides = [1, 1]} : vector<16x256xf32> to vector<2x128xf32>
    %252 = tpu.concatenate %250, %251 in 0 : vector<2x128xf32>, vector<2x128xf32> -> vector<4x128xf32>
    %253 = vector.extract_strided_slice %249 {offsets = [2, 0], sizes = [2, 128], strides = [1, 1]} : vector<16x256xf32> to vector<2x128xf32>
    %254 = vector.extract_strided_slice %249 {offsets = [12, 128], sizes = [2, 128], strides = [1, 1]} : vector<16x256xf32> to vector<2x128xf32>
    %255 = tpu.concatenate %253, %254 in 0 : vector<2x128xf32>, vector<2x128xf32> -> vector<4x128xf32>
    %256 = vector.extract_strided_slice %249 {offsets = [4, 0], sizes = [2, 128], strides = [1, 1]} : vector<16x256xf32> to vector<2x128xf32>
    %257 = vector.extract_strided_slice %249 {offsets = [10, 128], sizes = [2, 128], strides = [1, 1]} : vector<16x256xf32> to vector<2x128xf32>
    %258 = tpu.concatenate %256, %257 in 0 : vector<2x128xf32>, vector<2x128xf32> -> vector<4x128xf32>
    %259 = vector.extract_strided_slice %249 {offsets = [6, 0], sizes = [2, 128], strides = [1, 1]} : vector<16x256xf32> to vector<2x128xf32>
    %260 = vector.extract_strided_slice %249 {offsets = [8, 128], sizes = [2, 128], strides = [1, 1]} : vector<16x256xf32> to vector<2x128xf32>
    %261 = tpu.concatenate %259, %260 in 0 : vector<2x128xf32>, vector<2x128xf32> -> vector<4x128xf32>
    %262 = vector.extract_strided_slice %249 {offsets = [8, 0], sizes = [2, 128], strides = [1, 1]} : vector<16x256xf32> to vector<2x128xf32>
    %263 = vector.extract_strided_slice %249 {offsets = [6, 128], sizes = [2, 128], strides = [1, 1]} : vector<16x256xf32> to vector<2x128xf32>
    %264 = tpu.concatenate %262, %263 in 0 : vector<2x128xf32>, vector<2x128xf32> -> vector<4x128xf32>
    %265 = vector.extract_strided_slice %249 {offsets = [10, 0], sizes = [2, 128], strides = [1, 1]} : vector<16x256xf32> to vector<2x128xf32>
    %266 = vector.extract_strided_slice %249 {offsets = [4, 128], sizes = [2, 128], strides = [1, 1]} : vector<16x256xf32> to vector<2x128xf32>
    %267 = tpu.concatenate %265, %266 in 0 : vector<2x128xf32>, vector<2x128xf32> -> vector<4x128xf32>
    %268 = vector.extract_strided_slice %249 {offsets = [12, 0], sizes = [2, 128], strides = [1, 1]} : vector<16x256xf32> to vector<2x128xf32>
    %269 = vector.extract_strided_slice %249 {offsets = [2, 128], sizes = [2, 128], strides = [1, 1]} : vector<16x256xf32> to vector<2x128xf32>
    %270 = tpu.concatenate %268, %269 in 0 : vector<2x128xf32>, vector<2x128xf32> -> vector<4x128xf32>
    %271 = vector.extract_strided_slice %249 {offsets = [14, 0], sizes = [2, 128], strides = [1, 1]} : vector<16x256xf32> to vector<2x128xf32>
    %272 = vector.extract_strided_slice %249 {offsets = [0, 128], sizes = [2, 128], strides = [1, 1]} : vector<16x256xf32> to vector<2x128xf32>
    %273 = tpu.concatenate %271, %272 in 0 : vector<2x128xf32>, vector<2x128xf32> -> vector<4x128xf32>
    %cst_49 = arith.constant 0.000000e+00 : f32
    %274 = vector.broadcast %cst_49 : f32 to vector<4x64xf32>
    %cst_50 = arith.constant 0.000000e+00 : f32
    %275 = vector.broadcast %cst_50 : f32 to vector<4x32xf32>
    %cst_51 = arith.constant dense<0.000000e+00> : vector<4x128xf32>
    %276 = tpu.matmul %274, %244, %cst_51 {dimension_numbers = #tpu.dot_dimension_numbers<[1], [0], [0], [1], [0, 0, 1, 1], [], []>} : vector<4x64xf32>, vector<64x128xf32>, vector<4x128xf32> -> vector<4x128xf32>
    %277 = arith.addf %252, %276 : vector<4x128xf32>
    %278 = arith.mulf %277, %8 : vector<4x128xf32>
    %279 = math.tanh %278 : vector<4x128xf32>
    %cst_52 = arith.constant 5.000000e-01 : f32
    %280 = vector.broadcast %cst_52 : f32 to vector<4x128xf32>
    %281 = arith.mulf %280, %279 : vector<4x128xf32>
    %cst_53 = arith.constant 5.000000e-01 : f32
    %282 = vector.broadcast %cst_53 : f32 to vector<4x128xf32>
    %283 = arith.addf %281, %282 : vector<4x128xf32>
    %284 = arith.select %5, %279, %283 : vector<4x128xi1>, vector<4x128xf32>
    %285 = vector.extract_strided_slice %284 {offsets = [0, 0], sizes = [4, 32], strides = [1, 1]} : vector<4x128xf32> to vector<4x32xf32>
    %286 = vector.extract_strided_slice %284 {offsets = [0, 32], sizes = [4, 32], strides = [1, 1]} : vector<4x128xf32> to vector<4x32xf32>
    %287 = vector.extract_strided_slice %284 {offsets = [0, 64], sizes = [4, 32], strides = [1, 1]} : vector<4x128xf32> to vector<4x32xf32>
    %288 = vector.extract_strided_slice %284 {offsets = [0, 96], sizes = [4, 32], strides = [1, 1]} : vector<4x128xf32> to vector<4x32xf32>
    %289 = arith.mulf %286, %275 : vector<4x32xf32>
    %290 = arith.mulf %285, %287 : vector<4x32xf32>
    %291 = arith.addf %289, %290 : vector<4x32xf32>
    %292 = math.tanh %291 : vector<4x32xf32>
    %293 = arith.mulf %288, %292 : vector<4x32xf32>
    %294 = tpu.concatenate %293, %293 in 1 : vector<4x32xf32>, vector<4x32xf32> -> vector<4x64xf32>
    %295 = arith.mulf %294, %19 : vector<4x64xf32>
    %cst_54 = arith.constant dense<0.000000e+00> : vector<4x128xf32>
    %296 = tpu.matmul %295, %244, %cst_54 {dimension_numbers = #tpu.dot_dimension_numbers<[1], [0], [0], [1], [0, 0, 1, 1], [], []>} : vector<4x64xf32>, vector<64x128xf32>, vector<4x128xf32> -> vector<4x128xf32>
    %297 = arith.addf %255, %296 : vector<4x128xf32>
    %298 = arith.mulf %297, %8 : vector<4x128xf32>
    %299 = math.tanh %298 : vector<4x128xf32>
    %cst_55 = arith.constant 5.000000e-01 : f32
    %300 = vector.broadcast %cst_55 : f32 to vector<4x128xf32>
    %301 = arith.mulf %300, %299 : vector<4x128xf32>
    %cst_56 = arith.constant 5.000000e-01 : f32
    %302 = vector.broadcast %cst_56 : f32 to vector<4x128xf32>
    %303 = arith.addf %301, %302 : vector<4x128xf32>
    %304 = arith.select %5, %299, %303 : vector<4x128xi1>, vector<4x128xf32>
    %305 = vector.extract_strided_slice %304 {offsets = [0, 0], sizes = [4, 32], strides = [1, 1]} : vector<4x128xf32> to vector<4x32xf32>
    %306 = vector.extract_strided_slice %304 {offsets = [0, 32], sizes = [4, 32], strides = [1, 1]} : vector<4x128xf32> to vector<4x32xf32>
    %307 = vector.extract_strided_slice %304 {offsets = [0, 64], sizes = [4, 32], strides = [1, 1]} : vector<4x128xf32> to vector<4x32xf32>
    %308 = vector.extract_strided_slice %304 {offsets = [0, 96], sizes = [4, 32], strides = [1, 1]} : vector<4x128xf32> to vector<4x32xf32>
    %309 = arith.mulf %306, %291 : vector<4x32xf32>
    %310 = arith.mulf %305, %307 : vector<4x32xf32>
    %311 = arith.addf %309, %310 : vector<4x32xf32>
    %312 = math.tanh %311 : vector<4x32xf32>
    %313 = arith.mulf %308, %312 : vector<4x32xf32>
    %314 = tpu.concatenate %313, %313 in 1 : vector<4x32xf32>, vector<4x32xf32> -> vector<4x64xf32>
    %315 = arith.mulf %314, %19 : vector<4x64xf32>
    %cst_57 = arith.constant dense<0.000000e+00> : vector<4x128xf32>
    %316 = tpu.matmul %315, %244, %cst_57 {dimension_numbers = #tpu.dot_dimension_numbers<[1], [0], [0], [1], [0, 0, 1, 1], [], []>} : vector<4x64xf32>, vector<64x128xf32>, vector<4x128xf32> -> vector<4x128xf32>
    %317 = arith.addf %258, %316 : vector<4x128xf32>
    %318 = arith.mulf %317, %8 : vector<4x128xf32>
    %319 = math.tanh %318 : vector<4x128xf32>
    %cst_58 = arith.constant 5.000000e-01 : f32
    %320 = vector.broadcast %cst_58 : f32 to vector<4x128xf32>
    %321 = arith.mulf %320, %319 : vector<4x128xf32>
    %cst_59 = arith.constant 5.000000e-01 : f32
    %322 = vector.broadcast %cst_59 : f32 to vector<4x128xf32>
    %323 = arith.addf %321, %322 : vector<4x128xf32>
    %324 = arith.select %5, %319, %323 : vector<4x128xi1>, vector<4x128xf32>
    %325 = vector.extract_strided_slice %324 {offsets = [0, 0], sizes = [4, 32], strides = [1, 1]} : vector<4x128xf32> to vector<4x32xf32>
    %326 = vector.extract_strided_slice %324 {offsets = [0, 32], sizes = [4, 32], strides = [1, 1]} : vector<4x128xf32> to vector<4x32xf32>
    %327 = vector.extract_strided_slice %324 {offsets = [0, 64], sizes = [4, 32], strides = [1, 1]} : vector<4x128xf32> to vector<4x32xf32>
    %328 = vector.extract_strided_slice %324 {offsets = [0, 96], sizes = [4, 32], strides = [1, 1]} : vector<4x128xf32> to vector<4x32xf32>
    %329 = arith.mulf %326, %311 : vector<4x32xf32>
    %330 = arith.mulf %325, %327 : vector<4x32xf32>
    %331 = arith.addf %329, %330 : vector<4x32xf32>
    %332 = math.tanh %331 : vector<4x32xf32>
    %333 = arith.mulf %328, %332 : vector<4x32xf32>
    %334 = tpu.concatenate %333, %333 in 1 : vector<4x32xf32>, vector<4x32xf32> -> vector<4x64xf32>
    %335 = arith.mulf %334, %19 : vector<4x64xf32>
    %cst_60 = arith.constant dense<0.000000e+00> : vector<4x128xf32>
    %336 = tpu.matmul %335, %244, %cst_60 {dimension_numbers = #tpu.dot_dimension_numbers<[1], [0], [0], [1], [0, 0, 1, 1], [], []>} : vector<4x64xf32>, vector<64x128xf32>, vector<4x128xf32> -> vector<4x128xf32>
    %337 = arith.addf %261, %336 : vector<4x128xf32>
    %338 = arith.mulf %337, %8 : vector<4x128xf32>
    %339 = math.tanh %338 : vector<4x128xf32>
    %cst_61 = arith.constant 5.000000e-01 : f32
    %340 = vector.broadcast %cst_61 : f32 to vector<4x128xf32>
    %341 = arith.mulf %340, %339 : vector<4x128xf32>
    %cst_62 = arith.constant 5.000000e-01 : f32
    %342 = vector.broadcast %cst_62 : f32 to vector<4x128xf32>
    %343 = arith.addf %341, %342 : vector<4x128xf32>
    %344 = arith.select %5, %339, %343 : vector<4x128xi1>, vector<4x128xf32>
    %345 = vector.extract_strided_slice %344 {offsets = [0, 0], sizes = [4, 32], strides = [1, 1]} : vector<4x128xf32> to vector<4x32xf32>
    %346 = vector.extract_strided_slice %344 {offsets = [0, 32], sizes = [4, 32], strides = [1, 1]} : vector<4x128xf32> to vector<4x32xf32>
    %347 = vector.extract_strided_slice %344 {offsets = [0, 64], sizes = [4, 32], strides = [1, 1]} : vector<4x128xf32> to vector<4x32xf32>
    %348 = vector.extract_strided_slice %344 {offsets = [0, 96], sizes = [4, 32], strides = [1, 1]} : vector<4x128xf32> to vector<4x32xf32>
    %349 = arith.mulf %346, %331 : vector<4x32xf32>
    %350 = arith.mulf %345, %347 : vector<4x32xf32>
    %351 = arith.addf %349, %350 : vector<4x32xf32>
    %352 = math.tanh %351 : vector<4x32xf32>
    %353 = arith.mulf %348, %352 : vector<4x32xf32>
    %354 = tpu.concatenate %353, %353 in 1 : vector<4x32xf32>, vector<4x32xf32> -> vector<4x64xf32>
    %355 = arith.mulf %354, %19 : vector<4x64xf32>
    %cst_63 = arith.constant dense<0.000000e+00> : vector<4x128xf32>
    %356 = tpu.matmul %355, %244, %cst_63 {dimension_numbers = #tpu.dot_dimension_numbers<[1], [0], [0], [1], [0, 0, 1, 1], [], []>} : vector<4x64xf32>, vector<64x128xf32>, vector<4x128xf32> -> vector<4x128xf32>
    %357 = arith.addf %264, %356 : vector<4x128xf32>
    %358 = arith.mulf %357, %8 : vector<4x128xf32>
    %359 = math.tanh %358 : vector<4x128xf32>
    %cst_64 = arith.constant 5.000000e-01 : f32
    %360 = vector.broadcast %cst_64 : f32 to vector<4x128xf32>
    %361 = arith.mulf %360, %359 : vector<4x128xf32>
    %cst_65 = arith.constant 5.000000e-01 : f32
    %362 = vector.broadcast %cst_65 : f32 to vector<4x128xf32>
    %363 = arith.addf %361, %362 : vector<4x128xf32>
    %364 = arith.select %5, %359, %363 : vector<4x128xi1>, vector<4x128xf32>
    %365 = vector.extract_strided_slice %364 {offsets = [0, 0], sizes = [4, 32], strides = [1, 1]} : vector<4x128xf32> to vector<4x32xf32>
    %366 = vector.extract_strided_slice %364 {offsets = [0, 32], sizes = [4, 32], strides = [1, 1]} : vector<4x128xf32> to vector<4x32xf32>
    %367 = vector.extract_strided_slice %364 {offsets = [0, 64], sizes = [4, 32], strides = [1, 1]} : vector<4x128xf32> to vector<4x32xf32>
    %368 = vector.extract_strided_slice %364 {offsets = [0, 96], sizes = [4, 32], strides = [1, 1]} : vector<4x128xf32> to vector<4x32xf32>
    %369 = arith.mulf %366, %351 : vector<4x32xf32>
    %370 = arith.mulf %365, %367 : vector<4x32xf32>
    %371 = arith.addf %369, %370 : vector<4x32xf32>
    %372 = math.tanh %371 : vector<4x32xf32>
    %373 = arith.mulf %368, %372 : vector<4x32xf32>
    %374 = tpu.concatenate %373, %373 in 1 : vector<4x32xf32>, vector<4x32xf32> -> vector<4x64xf32>
    %375 = arith.mulf %374, %19 : vector<4x64xf32>
    %cst_66 = arith.constant dense<0.000000e+00> : vector<4x128xf32>
    %376 = tpu.matmul %375, %244, %cst_66 {dimension_numbers = #tpu.dot_dimension_numbers<[1], [0], [0], [1], [0, 0, 1, 1], [], []>} : vector<4x64xf32>, vector<64x128xf32>, vector<4x128xf32> -> vector<4x128xf32>
    %377 = arith.addf %267, %376 : vector<4x128xf32>
    %378 = arith.mulf %377, %8 : vector<4x128xf32>
    %379 = math.tanh %378 : vector<4x128xf32>
    %cst_67 = arith.constant 5.000000e-01 : f32
    %380 = vector.broadcast %cst_67 : f32 to vector<4x128xf32>
    %381 = arith.mulf %380, %379 : vector<4x128xf32>
    %cst_68 = arith.constant 5.000000e-01 : f32
    %382 = vector.broadcast %cst_68 : f32 to vector<4x128xf32>
    %383 = arith.addf %381, %382 : vector<4x128xf32>
    %384 = arith.select %5, %379, %383 : vector<4x128xi1>, vector<4x128xf32>
    %385 = vector.extract_strided_slice %384 {offsets = [0, 0], sizes = [4, 32], strides = [1, 1]} : vector<4x128xf32> to vector<4x32xf32>
    %386 = vector.extract_strided_slice %384 {offsets = [0, 32], sizes = [4, 32], strides = [1, 1]} : vector<4x128xf32> to vector<4x32xf32>
    %387 = vector.extract_strided_slice %384 {offsets = [0, 64], sizes = [4, 32], strides = [1, 1]} : vector<4x128xf32> to vector<4x32xf32>
    %388 = vector.extract_strided_slice %384 {offsets = [0, 96], sizes = [4, 32], strides = [1, 1]} : vector<4x128xf32> to vector<4x32xf32>
    %389 = arith.mulf %386, %371 : vector<4x32xf32>
    %390 = arith.mulf %385, %387 : vector<4x32xf32>
    %391 = arith.addf %389, %390 : vector<4x32xf32>
    %392 = math.tanh %391 : vector<4x32xf32>
    %393 = arith.mulf %388, %392 : vector<4x32xf32>
    %394 = tpu.concatenate %393, %393 in 1 : vector<4x32xf32>, vector<4x32xf32> -> vector<4x64xf32>
    %395 = arith.mulf %394, %19 : vector<4x64xf32>
    %cst_69 = arith.constant dense<0.000000e+00> : vector<4x128xf32>
    %396 = tpu.matmul %395, %244, %cst_69 {dimension_numbers = #tpu.dot_dimension_numbers<[1], [0], [0], [1], [0, 0, 1, 1], [], []>} : vector<4x64xf32>, vector<64x128xf32>, vector<4x128xf32> -> vector<4x128xf32>
    %397 = arith.addf %270, %396 : vector<4x128xf32>
    %398 = arith.mulf %397, %8 : vector<4x128xf32>
    %399 = math.tanh %398 : vector<4x128xf32>
    %cst_70 = arith.constant 5.000000e-01 : f32
    %400 = vector.broadcast %cst_70 : f32 to vector<4x128xf32>
    %401 = arith.mulf %400, %399 : vector<4x128xf32>
    %cst_71 = arith.constant 5.000000e-01 : f32
    %402 = vector.broadcast %cst_71 : f32 to vector<4x128xf32>
    %403 = arith.addf %401, %402 : vector<4x128xf32>
    %404 = arith.select %5, %399, %403 : vector<4x128xi1>, vector<4x128xf32>
    %405 = vector.extract_strided_slice %404 {offsets = [0, 0], sizes = [4, 32], strides = [1, 1]} : vector<4x128xf32> to vector<4x32xf32>
    %406 = vector.extract_strided_slice %404 {offsets = [0, 32], sizes = [4, 32], strides = [1, 1]} : vector<4x128xf32> to vector<4x32xf32>
    %407 = vector.extract_strided_slice %404 {offsets = [0, 64], sizes = [4, 32], strides = [1, 1]} : vector<4x128xf32> to vector<4x32xf32>
    %408 = vector.extract_strided_slice %404 {offsets = [0, 96], sizes = [4, 32], strides = [1, 1]} : vector<4x128xf32> to vector<4x32xf32>
    %409 = arith.mulf %406, %391 : vector<4x32xf32>
    %410 = arith.mulf %405, %407 : vector<4x32xf32>
    %411 = arith.addf %409, %410 : vector<4x32xf32>
    %412 = math.tanh %411 : vector<4x32xf32>
    %413 = arith.mulf %408, %412 : vector<4x32xf32>
    %414 = tpu.concatenate %413, %413 in 1 : vector<4x32xf32>, vector<4x32xf32> -> vector<4x64xf32>
    %415 = arith.mulf %414, %19 : vector<4x64xf32>
    %cst_72 = arith.constant dense<0.000000e+00> : vector<4x128xf32>
    %416 = tpu.matmul %415, %244, %cst_72 {dimension_numbers = #tpu.dot_dimension_numbers<[1], [0], [0], [1], [0, 0, 1, 1], [], []>} : vector<4x64xf32>, vector<64x128xf32>, vector<4x128xf32> -> vector<4x128xf32>
    %417 = arith.addf %273, %416 : vector<4x128xf32>
    %418 = arith.mulf %417, %8 : vector<4x128xf32>
    %419 = math.tanh %418 : vector<4x128xf32>
    %cst_73 = arith.constant 5.000000e-01 : f32
    %420 = vector.broadcast %cst_73 : f32 to vector<4x128xf32>
    %421 = arith.mulf %420, %419 : vector<4x128xf32>
    %cst_74 = arith.constant 5.000000e-01 : f32
    %422 = vector.broadcast %cst_74 : f32 to vector<4x128xf32>
    %423 = arith.addf %421, %422 : vector<4x128xf32>
    %424 = arith.select %5, %419, %423 : vector<4x128xi1>, vector<4x128xf32>
    %425 = vector.extract_strided_slice %424 {offsets = [0, 0], sizes = [4, 32], strides = [1, 1]} : vector<4x128xf32> to vector<4x32xf32>
    %426 = vector.extract_strided_slice %424 {offsets = [0, 32], sizes = [4, 32], strides = [1, 1]} : vector<4x128xf32> to vector<4x32xf32>
    %427 = vector.extract_strided_slice %424 {offsets = [0, 64], sizes = [4, 32], strides = [1, 1]} : vector<4x128xf32> to vector<4x32xf32>
    %428 = vector.extract_strided_slice %424 {offsets = [0, 96], sizes = [4, 32], strides = [1, 1]} : vector<4x128xf32> to vector<4x32xf32>
    %429 = arith.mulf %426, %411 : vector<4x32xf32>
    %430 = arith.mulf %425, %427 : vector<4x32xf32>
    %431 = arith.addf %429, %430 : vector<4x32xf32>
    %432 = math.tanh %431 : vector<4x32xf32>
    %433 = arith.mulf %428, %432 : vector<4x32xf32>
    %434 = tpu.concatenate %433, %433 in 1 : vector<4x32xf32>, vector<4x32xf32> -> vector<4x64xf32>
    %435 = arith.mulf %434, %19 : vector<4x64xf32>
    %436 = vector.extract_strided_slice %295 {offsets = [0, 0], sizes = [2, 64], strides = [1, 1]} : vector<4x64xf32> to vector<2x64xf32>
    %437 = vector.extract_strided_slice %435 {offsets = [2, 0], sizes = [2, 64], strides = [1, 1]} : vector<4x64xf32> to vector<2x64xf32>
    %438 = arith.addf %436, %437 : vector<2x64xf32>
    %439 = vector.extract_strided_slice %315 {offsets = [0, 0], sizes = [2, 64], strides = [1, 1]} : vector<4x64xf32> to vector<2x64xf32>
    %440 = vector.extract_strided_slice %415 {offsets = [2, 0], sizes = [2, 64], strides = [1, 1]} : vector<4x64xf32> to vector<2x64xf32>
    %441 = arith.addf %439, %440 : vector<2x64xf32>
    %442 = vector.extract_strided_slice %335 {offsets = [0, 0], sizes = [2, 64], strides = [1, 1]} : vector<4x64xf32> to vector<2x64xf32>
    %443 = vector.extract_strided_slice %395 {offsets = [2, 0], sizes = [2, 64], strides = [1, 1]} : vector<4x64xf32> to vector<2x64xf32>
    %444 = arith.addf %442, %443 : vector<2x64xf32>
    %445 = vector.extract_strided_slice %355 {offsets = [0, 0], sizes = [2, 64], strides = [1, 1]} : vector<4x64xf32> to vector<2x64xf32>
    %446 = vector.extract_strided_slice %375 {offsets = [2, 0], sizes = [2, 64], strides = [1, 1]} : vector<4x64xf32> to vector<2x64xf32>
    %447 = arith.addf %445, %446 : vector<2x64xf32>
    %448 = vector.extract_strided_slice %375 {offsets = [0, 0], sizes = [2, 64], strides = [1, 1]} : vector<4x64xf32> to vector<2x64xf32>
    %449 = vector.extract_strided_slice %355 {offsets = [2, 0], sizes = [2, 64], strides = [1, 1]} : vector<4x64xf32> to vector<2x64xf32>
    %450 = arith.addf %448, %449 : vector<2x64xf32>
    %451 = vector.extract_strided_slice %395 {offsets = [0, 0], sizes = [2, 64], strides = [1, 1]} : vector<4x64xf32> to vector<2x64xf32>
    %452 = vector.extract_strided_slice %335 {offsets = [2, 0], sizes = [2, 64], strides = [1, 1]} : vector<4x64xf32> to vector<2x64xf32>
    %453 = arith.addf %451, %452 : vector<2x64xf32>
    %454 = vector.extract_strided_slice %415 {offsets = [0, 0], sizes = [2, 64], strides = [1, 1]} : vector<4x64xf32> to vector<2x64xf32>
    %455 = vector.extract_strided_slice %315 {offsets = [2, 0], sizes = [2, 64], strides = [1, 1]} : vector<4x64xf32> to vector<2x64xf32>
    %456 = arith.addf %454, %455 : vector<2x64xf32>
    %457 = vector.extract_strided_slice %435 {offsets = [0, 0], sizes = [2, 64], strides = [1, 1]} : vector<4x64xf32> to vector<2x64xf32>
    %458 = vector.extract_strided_slice %295 {offsets = [2, 0], sizes = [2, 64], strides = [1, 1]} : vector<4x64xf32> to vector<2x64xf32>
    %459 = arith.addf %457, %458 : vector<2x64xf32>
    %460 = tpu.concatenate %438, %441, %444, %447, %450, %453, %456, %459 in 0 : vector<2x64xf32>, vector<2x64xf32>, vector<2x64xf32>, vector<2x64xf32>, vector<2x64xf32>, vector<2x64xf32>, vector<2x64xf32>, vector<2x64xf32> -> vector<16x64xf32>
    %c0_75 = arith.constant 0 : index
    %c0_76 = arith.constant 0 : index
    %461 = vector.load %arg3[%c0_75, %c0_76] : memref<192x128xf32, #tpu.memory_space<vmem>>, vector<64x128xf32>
    %cst_77 = arith.constant dense<0.000000e+00> : vector<16x128xf32>
    %462 = tpu.matmul %20, %461, %cst_77 {dimension_numbers = #tpu.dot_dimension_numbers<[1], [0], [0], [1], [0, 0, 1, 1], [], []>} : vector<16x64xf32>, vector<64x128xf32>, vector<16x128xf32> -> vector<16x128xf32>
    %c64 = arith.constant 64 : index
    %c0_78 = arith.constant 0 : index
    %463 = vector.load %arg3[%c64, %c0_78] : memref<192x128xf32, #tpu.memory_space<vmem>>, vector<64x128xf32>
    %cst_79 = arith.constant dense<0.000000e+00> : vector<16x128xf32>
    %464 = tpu.matmul %240, %463, %cst_79 {dimension_numbers = #tpu.dot_dimension_numbers<[1], [0], [0], [1], [0, 0, 1, 1], [], []>} : vector<16x64xf32>, vector<64x128xf32>, vector<16x128xf32> -> vector<16x128xf32>
    %465 = arith.addf %462, %464 : vector<16x128xf32>
    %c128 = arith.constant 128 : index
    %c0_80 = arith.constant 0 : index
    %466 = vector.load %arg3[%c128, %c0_80] : memref<192x128xf32, #tpu.memory_space<vmem>>, vector<64x128xf32>
    %cst_81 = arith.constant dense<0.000000e+00> : vector<16x128xf32>
    %467 = tpu.matmul %460, %466, %cst_81 {dimension_numbers = #tpu.dot_dimension_numbers<[1], [0], [0], [1], [0, 0, 1, 1], [], []>} : vector<16x64xf32>, vector<64x128xf32>, vector<16x128xf32> -> vector<16x128xf32>
    %468 = arith.addf %465, %467 : vector<16x128xf32>
    %c0_82 = arith.constant 0 : index
    %c0_83 = arith.constant 0 : index
    %469 = vector.load %arg4[%c0_82, %c0_83] : memref<1x128xf32, #tpu.memory_space<vmem>>, vector<1x128xf32>
    %470 = vector.broadcast %469 : vector<1x128xf32> to vector<16x128xf32>
    %471 = arith.addf %468, %470 : vector<16x128xf32>
    %c0_84 = arith.constant 0 : index
    %c0_85 = arith.constant 0 : index
    %472 = vector.load %arg5[%c0_84, %c0_85] : memref<16x128xf32, #tpu.memory_space<vmem>>, vector<16x128xf32>
    tpu.vector_store %arg5[%c0_84, %c0_85], %471 {strides = array<i32>} : memref<16x128xf32, #tpu.memory_space<vmem>>, vector<16x128xf32>,
    return
  }
}

</mosaic_0001>

<bundles_post_ra>
// kernel: skip_lstm_forward.1
= control target key start
LH: loop header
LB: loop body
LE: loop exit
PB: predicated region body
PF: predicated region fallthrough
CT: control target
= control target key end

     0   :  { %10 = vsyncpa [#allocation3], 0  ;;  %s4025_s0 = inlined_call_operand.vmem [shape: f32[16,64], index: 0, kind: input, shape index: {}]   ;;  %s4026_s1 = inlined_call_operand.hbm [shape: f32[2,64,384], index: 1, kind: input, shape index: {}]   ;;  %s4027_s2 = inlined_call_operand.vmem [shape: f32[2,1,256], index: 2, kind: input, shape index: {}]   ;;  %s4028_s3 = inlined_call_operand.hbm [shape: f32[192,128], index: 3, kind: input, shape index: {}]   ;;  %s4029_s4 = inlined_call_operand.vmem [shape: f32[1,128], index: 4, kind: input, shape index: {}]   ;;  %s4030_s5 = inlined_call_operand.vmem [shape: f32[16,128], index: 5, kind: output, shape index: {}]  }
   0x1   :  { %11 = vsyncpa [#allocation5], 0  ;;  %s3393_s18 = smov [#allocation2]   ;;  %s3345_s22 = scalar_lea.hbm %s4026_s1, 6144 }
   0x2   :  { %s19_s19 = sshll.u32 %s3393_s18, 4  ;;  %p3346_p0 = scmp.ne.s32.totalorder %s4026_s1, %s3345_s22  ;;  %s20_s19 = int_to_ptr.vmem [resolvable:$true] %s19_s19 }
   0x3   :  { %p3349_p1 = scmp.lt.u32.totalorder %s3345_s22, %s4026_s1 }
   0x5   :  { %p3351_p2 = pnand %p3349_p1, %p3346_p0 }
   0x7   :  { %3354 = shalt.err (!%p3351_p2)
}
   0x8   :  { %s3355_s27 = scalar_lea.vmem %s20_s19, 6144  ;;  %p3360_p4 = scmp.lt.s32.totalorder %s20_s19, %s20_s19 }
   0x9   :  { %p3356_p3 = scmp.ne.s32.totalorder %s20_s19, %s3355_s27  ;;  %p3361_p5 = scmp.lt.s32.totalorder %s3355_s27, %s3355_s27 }
   0xb   :  { %p3362_p6 = por %p3361_p5, %p3360_p4 }
   0xd   :  { %p3363_p7 = pnand %p3362_p6, %p3356_p3 }
   0xf   :  { %3366 = shalt.err (!%p3363_p7)
}
  0x10   :  { %s3394_s28 = smov 384   ;;  %s3395_s29 = smov 24  }
  0x11   :  { %25 = dma.hbm_to_vmem [thread:$0]  %s4026_s1, 6144, %s20_s19, [#allocation3], %s3394_s28, %s3394_s28, %s3395_s29  }
  0x12   :  { %s3396_s7 = smov [#allocation4]   ;;  %s3367_s11 = scalar_lea.hbm %s4028_s3, 3072 }
  0x13   :  { %s33_s8 = sshll.u32 %s3396_s7, 4  ;;  %p3368_p8 = scmp.ne.s32.totalorder %s4028_s3, %s3367_s11  ;;  %s34_s8 = int_to_ptr.vmem [resolvable:$true] %s33_s8 }
  0x14   :  { %p3371_p9 = scmp.lt.u32.totalorder %s3367_s11, %s4028_s3 }
  0x16   :  { %p3373_p10 = pnand %p3371_p9, %p3368_p8 }
  0x18   :  { %3376 = shalt.err (!%p3373_p10)
}
  0x19   :  { %s3377_s16 = scalar_lea.vmem %s34_s8, 3072  ;;  %p3382_p12 = scmp.lt.s32.totalorder %s34_s8, %s34_s8 }
  0x1a   :  { %p3378_p11 = scmp.ne.s32.totalorder %s34_s8, %s3377_s16  ;;  %p3383_p13 = scmp.lt.s32.totalorder %s3377_s16, %s3377_s16 }
  0x1c   :  { %p3384_p0 = por %p3383_p13, %p3382_p12 }
  0x1e   :  { %p3385_p1 = pnand %p3384_p0, %p3378_p11 }
  0x20   :  { %3388 = shalt.err (!%p3385_p1)
}
  0x21   :  { %s3397_s1 = smov 128   ;;  %s3398_s17 = smov 8  }
  0x22   :  { %39 = dma.hbm_to_vmem [thread:$0]  %s4028_s3, 3072, %s34_s8, [#allocation5], %s3397_s1, %s3397_s1, %s3398_s17  }
  0x23   :  { %3389 = dma.done.wait [#allocation3], 6144  }
  0x24   :  { %3390 = vsyncadd [#allocation3], 4294961152 }
  0x25   :  { %3391 = dma.done.wait [#allocation5], 3072  }
  0x26   :  { %3392 = vsyncadd [#allocation5], 4294964224  ;;  %v3399_v0 = vmov 0.0   ;;  %v3400_v1 = vmov 0.0|0.0   ;;  %vm3401_vm0 = vmmov 0   ;;  %v64_v2 = vld [vmem:[#allocation2 + $0x8] sm:$0xff]  ;;  %v48_v40 = vlaneseq }
  0x27   :  { %170 = vmatprep.mubr.f32.mxu1 %v3399_v0  ;;  %3018 = vmatprep.subr.bf16.mxu0 %v3400_v1  ;;  %v66_v3 = vld [vmem:[#allocation2 + $0x20] sm:$0xff]  ;;  %v65_v6 = vld [vmem:[#allocation2 + $0x18] sm:$0xff]  ;;  %v70_v8 = vld [vmem:[#allocation2 + $0x50] sm:$0xff]  ;;  %vm99_vm1 = vcmask 523264   ;;  %vm186_vm2 = vcmask 1041408   ;;  %s3403_s25 = smov 64  }
  0x28   :  { %2664 = vmatprep.mubr.msk.f32.mxu0 %vm3401_vm0, %v3399_v0  ;;  %v63_v4 = vld [vmem:[#allocation2] sm:$0xff]  ;;  %v2990_v5 = vpack.c.bf16 %v66_v3, %v64_v2  ;;  %v68_v7 = vld [vmem:[#allocation2 + $0x38] sm:$0xff]  ;;  %v67_v11 = vld [vmem:[#allocation2 + $0x30] sm:$0xff]  ;;  %v3511_v41 = vshrl.u32 %v48_v40, 7  ;;  %v49_v53 = vand.u32 127, %v48_v40  ;;  %s3404_s26 = smov 32  }
  0x29   :  { %v2992_v9 = vpack.c.bf16 %v65_v6, %v63_v4  ;;  %v2994_v10 = vpack.c.bf16 %v70_v8, %v68_v7  ;;  %v69_v12 = vld [vmem:[#allocation2 + $0x48] sm:$0xff]  ;;  %v74_v14 = vld [vmem:[#allocation2 + $0x80] sm:$0xff]  ;;  %v73_v18 = vld [vmem:[#allocation2 + $0x78] sm:$0xff]  ;;  %vm3405_vm9 = vmmov 1   ;;  %vm323_vm11 = vcmask 261120  }
  0x2a   :  { %v72_v13 = vld [vmem:[#allocation2 + $0x68] sm:$0xff]  ;;  %2991 = vmatprep.subr.bf16.mxu1 %v2990_v5  ;;  %v2996_v15 = vpack.c.bf16 %v69_v12, %v67_v11  ;;  %v71_v17 = vld [vmem:[#allocation2 + $0x60] sm:$0xff]  ;;  %v79_v19 = vld [vmem:[#allocation2 + $0x10] sm:$0xff]  ;;  %v91_v42 = vsub.s32 0, %v3511_v41  ;;  %v95_v44 = vsub.s32 1, %v3511_v41  ;;  %vm50_vm3 = vcmp.ge.s32.totalorder %v49_v53, 64 }
  0x2b   :  { %2993 = vmatpush1.bf16.msra.mxu1 %v2992_v9  ;;  %v2998_v16 = vpack.c.bf16 %v74_v14, %v72_v13  ;;  %v76_v20 = vld [vmem:[#allocation2 + $0x98] sm:$0xff]  ;;  %v78_v21 = vld [vmem:[#allocation2 + $0xb0] sm:$0xff]  ;;  %v80_v22 = vld [vmem:[#allocation2 + $0x28] sm:$0xff]  ;;  %v3000_v24 = vpack.c.bf16 %v73_v18, %v71_v17  ;;  %vm51_vm4 = vcmp.lt.s32.totalorder %v49_v53, 96  ;;  %vm56_vm6 = vcmp.lt.s32.totalorder %v3511_v41, 2 }
  0x2c   :  { %2995 = vmatprep.subr.bf16.mxu1 %v2994_v10  ;;  %v3464_v23 = vpack.c.bf16 %v80_v22, %v79_v19  ;;  %v81_v25 = vld [vmem:[#allocation2 + $0x40] sm:$0xff]  ;;  %v82_v26 = vld [vmem:[#allocation2 + $0x58] sm:$0xff]  ;;  %v3002_v27 = vpack.c.bf16 %v78_v21, %v76_v20  ;;  %v75_v28 = vld [vmem:[#allocation2 + $0x90] sm:$0xff]  ;;  %vm57_vm7 = vcmp.lt.s32.totalorder %v49_v53, 32  ;;  %vm1105_vm12 = vcmask 1043456  }
  0x2d   :  { %v77_v29 = vld [vmem:[#allocation2 + $0xa8] sm:$0xff]  ;;  %v3468_v30 = vpack.c.bf16 %v82_v26, %v81_v25  ;;  %v83_v32 = vld [vmem:[#allocation2 + $0x70] sm:$0xff]  ;;  %v61_v35 = vld [vmem:[%s4025_s0] sm:$0xff]  ;;  %vm1107_vm13 = vcmask 1045504  }
  0x2e   :  { %3020 = vmatpush3.bf16.msra.mxu0 %v3464_v23  ;;  %v3004_v31 = vpack.c.bf16 %v77_v29, %v75_v28  ;;  %v84_v33 = vld [vmem:[#allocation2 + $0x88] sm:$0xff]  ;;  %v85_v36 = vld [vmem:[#allocation2 + $0xa0] sm:$0xff]  ;;  %v86_v37 = vld [vmem:[#allocation2 + $0xb8] sm:$0xff] }
  0x2f   :  { %2997 = vmatpush1.bf16.msra.mxu1 %v2996_v15  ;;  %3021 = vmatprep.subr.bf16.mxu0 %v3400_v1  ;;  %v3472_v34 = vpack.c.bf16 %v84_v33, %v83_v32  ;;  %v3481_v38 = vpack.c.bf16 %v86_v37, %v85_v36  ;;  %v62_v39 = vld [vmem:[%s4025_s0 + $0x8] sm:$0xff]  ;;  %v87_v43 = vld [vmem:[%s4027_s2] sm:$0x3]  ;;  %vm3542_vm5 = vmand %vm50_vm3, %vm51_vm4  ;;  %v3402_v15 = vmov 0.5  }
  0x30   :  { %2999 = vmatprep.subr.bf16.mxu1 %v2998_v16  ;;  %v92_v45 = vrot.slane %v87_v43, %v91_v42  ;;  %v96_v46 = vrot.slane %v87_v43, %v95_v44  ;;  %v3548_v16 = vsel %vm3542_vm5, 1.0, %v3402_v15  ;;  %vm58_vm8 = vmxor %vm56_vm6, %vm57_vm7 }
  0x31   :  { %vm59_vm10 = vmxor %vm58_vm8, %vm3405_vm9 }
  0x32   :  { %3023 = vmatpush3.bf16.msra.mxu0 %v3468_v30  ;;  %v3560_v36 = vsel %vm59_vm10, 1.0, %v3399_v0 }
  0x33   :  { %3001 = vmatpush1.bf16.msra.mxu1 %v3000_v24  ;;  %3024 = vmatprep.subr.bf16.mxu0 %v3400_v1 }
  0x34   :  { %3003 = vmatprep.subr.bf16.mxu1 %v3002_v27 }
  0x36   :  { %3026 = vmatpush3.bf16.msra.mxu0 %v3472_v34 }
  0x37   :  { %3005 = vmatpush1.bf16.msra.mxu1 %v3004_v31  ;;  %3027 = vmatprep.subr.bf16.mxu0 %v3400_v1 }
  0x38   :  { %3006 = vmatprep.subr.bf16.mxu1 %v3400_v1 }
  0x3a   :  { %2429 = vmatmul.mubr.msk.f32.vlgmr.msra.gmra.mrb[0].mxu1 %vm99_vm1, %v61_v35  ;;  %3029 = vmatpush3.bf16.msra.mxu0 %v3481_v38 }
  0x3b   :  { %3008 = vmatpush3.bf16.msra.mxu1 %v3464_v23  ;;  %176 = vmatprep.mubr.f32.mxu1 %v3399_v0 }
  0x3c   :  { %3009 = vmatprep.subr.bf16.mxu1 %v3400_v1  ;;  %3042 = vmatprep.subr.bf16.mxu0 %v3400_v1 }
  0x3e   :  { %2430 = vmatmul.mubr.msk.f32.gmra.mrb[2].mxu1 %vm99_vm1, %v62_v39 }
  0x3f   :  { %3011 = vmatpush3.bf16.msra.mxu1 %v3468_v30  ;;  %2645 = vmatprep.mubr.msk.f32.mxu1 %vm3401_vm0, %v3399_v0 }
  0x40   :  { %3012 = vmatprep.subr.bf16.mxu1 %v3400_v1 }
  0x43   :  { %3014 = vmatpush3.bf16.msra.mxu1 %v3472_v34 }
  0x44   :  { %3015 = vmatprep.subr.bf16.mxu1 %v3400_v1 }
  0x47   :  { %3017 = vmatpush3.bf16.msra.mxu1 %v3481_v38 }
  0x48   :  { %3030 = vmatprep.subr.bf16.mxu1 %v3400_v1 }
  0x4a   :  { %2646 = vmatmul.mubr.f32.vlgmr.msra.gmra.mrb[4].mxu1 %v3399_v0 }
  0x4b   :  { %3032 = vmatpush3.bf16.msra.mxu1 %v3464_v23  ;;  %2683 = vmatprep.mubr.msk.f32.mxu1 %vm3401_vm0, %v3399_v0 }
  0x4c   :  { %3033 = vmatprep.subr.bf16.mxu1 %v3400_v1 }
  0x4f   :  { %3035 = vmatpush3.bf16.msra.mxu1 %v3468_v30 }
  0x50   :  { %3036 = vmatprep.subr.bf16.mxu1 %v3400_v1 }
  0x53   :  { %3038 = vmatpush3.bf16.msra.mxu1 %v3472_v34 }
  0x54   :  { %3039 = vmatprep.subr.bf16.mxu1 %v3400_v1 }
  0x57   :  { %3041 = vmatpush3.bf16.msra.mxu1 %v3481_v38 }
  0x58   :  { %3054 = vmatprep.subr.bf16.mxu1 %v3400_v1 }
 0x10d   :  { %v172_v47 = vpop.f32.mrb[0].mxu1 }
 0x10e   :  { %v173_v48 = vadd.f32 %v172_v47, %v92_v45  ;;  %v174_v49 = vpop.f32.mrb[1].mxu1 }
 0x10f   :  { %v175_v50 = vadd.f32 %v174_v49, %v96_v46 }
 0x110   :  { %v189_v56 = vrot.slane %v173_v48, 2  ;;  %v194_v57 = vrot.slane %v173_v48, 4  ;;  %v197_v59 = vrot.slane %v173_v48, 6 }
 0x111   :  { %v178_v51 = vpop.f32.mrb[2].mxu1  ;;  %v203_v52 = vrot.slane %v175_v50, 4  ;;  %v209_v60 = vrot.slane %v175_v50, 2  ;;  %v217_v61 = vrot.slane %v175_v50, 6 }
 0x112   :  { %v179_v54 = vadd.f32 %v178_v51, %v92_v45  ;;  %v180_v55 = vpop.f32.mrb[3].mxu1 }
 0x113   :  { %v181_v58 = vadd.f32 %v180_v55, %v96_v46 }
 0x114   :  { %v3523_v62 = vsel %vm186_vm2, %v179_v54, %v203_v52  ;;  %v207_v63 = vrot.slane %v179_v54, 2  ;;  %v212_v2 = vrot.slane %v179_v54, 4  ;;  %v215_v3 = vrot.slane %v179_v54, 6 }
 0x115   :  { %v184_v4 = vrot.slane %v181_v58, 4  ;;  %v191_v5 = vrot.slane %v181_v58, 2  ;;  %v3526_v6 = vsel %vm186_vm2, %v194_v57, %v181_v58  ;;  %v199_v7 = vrot.slane %v181_v58, 6 }
 0x116   :  { %v3529_v8 = vsel %vm186_vm2, %v207_v63, %v209_v60  ;;  %v3532_v9 = vsel %vm186_vm2, %v212_v2, %v175_v50  ;;  %v3535_v10 = vsel %vm186_vm2, %v215_v3, %v217_v61 }
 0x117   :  { %v187_v11 = vsel %vm186_vm2, %v173_v48, %v184_v4  ;;  %v193_v12 = vsel %vm186_vm2, %v189_v56, %v191_v5  ;;  %v3540_v13 = vsel %vm186_vm2, %v197_v59, %v199_v7 }
 0x11d   :  { %v289_v17 = vpop.f32.mrb[4].mxu1 }
 0x11e   :  { %v293_v18 = vadd.f32 %v289_v17, %v187_v11  ;;  %v2647_v19 = vpop.f32.mrb[5].mxu1 }
 0x120   :  { %v294_v20 = vmul.f32 %v293_v18, %v3548_v16 }
 0x122   :  { %3279 = vtanh.f32 %v294_v20 }
 0x12c   :  { %v3280_v21 = vpop.eup %3279 }
 0x12d   :  { %v296_v22 = vmul.f32 0.5, %v3280_v21 }
 0x12f   :  { %v297_v24 = vadd.f32 0.5, %v296_v22 }
 0x131   :  { %v298_v25 = vsel %vm3542_vm5, %v3280_v21, %v297_v24 }
 0x132   :  { %301 = vrot.lane.b32.xlu0 %v298_v25, %s3403_s25  ;;  %v299_v28 = vmul.f32 0.0, %v298_v25 }
 0x1a4   :  { %v302_v26 = vpop.permute.xlu0 %301 }
 0x1a5   :  { %v304_v27 = vmul.f32 %v302_v26, %v298_v25 }
 0x1a7   :  { %306 = vrot.lane.b32.xlu0 %v304_v27, %s3404_s26 }
 0x219   :  { %v307_v29 = vpop.permute.xlu0 %306 }
 0x21a   :  { %v309_v31 = vadd.f32 %v307_v29, %v299_v28 }
 0x21c   :  { %3281 = vtanh.f32 %v309_v31 }
 0x226   :  { %v3282_v32 = vpop.eup %3281 }
 0x227   :  { %312 = vrot.lane.b32.xlu1 %v3282_v32, %s3403_s25 }
 0x299   :  { %v313_v33 = vpop.permute.xlu1 %312 }
 0x29a   :  { %v315_v35 = vmul.f32 %v313_v33, %v298_v25 }
 0x29c   :  { %320 = vrot.lane.b32.xlu0 %v315_v35, %s3403_s25  ;;  %317 = vrot.lane.b32.xlu1 %v315_v35, %s3404_s26 }
 0x30e   :  { %v321_v37 = vpop.permute.xlu0 %320  ;;  %v318_v39 = vpop.permute.xlu1 %317 }
 0x30f   :  { %v324_v40 = vsel %vm323_vm11, %v318_v39, %v321_v37 }
 0x310   :  { %v3564_v43 = vmul.f32 %v324_v40, %v3560_v36 }
 0x312   :  { %2665 = vmatmul.mubr.msk.f32.vlgmr.msra.gmra.mrb[0].mxu0 %vm99_vm1, %v3564_v43 }
 0x313   :  { %3044 = vmatpush3.bf16.msra.mxu0 %v3464_v23  ;;  %2702 = vmatprep.mubr.msk.f32.mxu0 %vm3401_vm0, %v3399_v0 }
 0x314   :  { %3045 = vmatprep.subr.bf16.mxu0 %v3400_v1 }
 0x317   :  { %3047 = vmatpush3.bf16.msra.mxu0 %v3468_v30 }
 0x318   :  { %3048 = vmatprep.subr.bf16.mxu0 %v3400_v1 }
 0x31b   :  { %3050 = vmatpush3.bf16.msra.mxu0 %v3472_v34 }
 0x31c   :  { %3051 = vmatprep.subr.bf16.mxu0 %v3400_v1 }
 0x31f   :  { %3053 = vmatpush3.bf16.msra.mxu0 %v3481_v38 }
 0x320   :  { %3066 = vmatprep.subr.bf16.mxu0 %v3400_v1 }
 0x3e5   :  { %v395_v45 = vpop.f32.mrb[0].mxu0 }
 0x3e6   :  { %v399_v46 = vadd.f32 %v395_v45, %v193_v12  ;;  %v2666_v47 = vpop.f32.mrb[1].mxu0 }
 0x3e8   :  { %v400_v48 = vmul.f32 %v399_v46, %v3548_v16 }
 0x3ea   :  { %3283 = vtanh.f32 %v400_v48 }
 0x3f4   :  { %v3284_v49 = vpop.eup %3283 }
 0x3f5   :  { %v402_v50 = vmul.f32 0.5, %v3284_v49 }
 0x3f7   :  { %v403_v51 = vadd.f32 0.5, %v402_v50 }
 0x3f9   :  { %v404_v52 = vsel %vm3542_vm5, %v3284_v49, %v403_v51 }
 0x3fa   :  { %407 = vrot.lane.b32.xlu1 %v404_v52, %s3403_s25  ;;  %v405_v55 = vmul.f32 %v404_v52, %v309_v31 }
 0x46c   :  { %v408_v53 = vpop.permute.xlu1 %407 }
 0x46d   :  { %v410_v54 = vmul.f32 %v408_v53, %v404_v52 }
 0x46f   :  { %412 = vrot.lane.b32.xlu0 %v410_v54, %s3404_s26 }
 0x4e1   :  { %v413_v56 = vpop.permute.xlu0 %412 }
 0x4e2   :  { %v415_v57 = vadd.f32 %v413_v56, %v405_v55 }
 0x4e4   :  { %3285 = vtanh.f32 %v415_v57 }
 0x4ee   :  { %v3286_v58 = vpop.eup %3285 }
 0x4ef   :  { %418 = vrot.lane.b32.xlu1 %v3286_v58, %s3403_s25 }
 0x561   :  { %v419_v59 = vpop.permute.xlu1 %418 }
 0x562   :  { %v421_v60 = vmul.f32 %v419_v59, %v404_v52 }
 0x564   :  { %426 = vrot.lane.b32.xlu1 %v421_v60, %s3403_s25  ;;  %423 = vrot.lane.b32.xlu0 %v421_v60, %s3404_s26 }
 0x5d6   :  { %v427_v61 = vpop.permute.xlu1 %426  ;;  %v424_v63 = vpop.permute.xlu0 %423 }
 0x5d7   :  { %v429_v2 = vsel %vm323_vm11, %v424_v63, %v427_v61 }
 0x5d8   :  { %v3588_v3 = vmul.f32 %v429_v2, %v3560_v36 }
 0x5da   :  { %2684 = vmatmul.mubr.msk.f32.vlgmr.msra.gmra.mrb[6].mxu1 %vm99_vm1, %v3588_v3 }
 0x5db   :  { %3056 = vmatpush3.bf16.msra.mxu1 %v3464_v23  ;;  %2721 = vmatprep.mubr.msk.f32.mxu1 %vm3401_vm0, %v3399_v0 }
 0x5dc   :  { %3057 = vmatprep.subr.bf16.mxu1 %v3400_v1 }
 0x5df   :  { %3059 = vmatpush3.bf16.msra.mxu1 %v3468_v30 }
 0x5e0   :  { %3060 = vmatprep.subr.bf16.mxu1 %v3400_v1 }
 0x5e3   :  { %3062 = vmatpush3.bf16.msra.mxu1 %v3472_v34 }
 0x5e4   :  { %3063 = vmatprep.subr.bf16.mxu1 %v3400_v1 }
 0x5e7   :  { %3065 = vmatpush3.bf16.msra.mxu1 %v3481_v38 }
 0x5e8   :  { %3078 = vmatprep.subr.bf16.mxu1 %v3400_v1 }
 0x6ad   :  { %v500_v4 = vpop.f32.mrb[6].mxu1 }
 0x6ae   :  { %v504_v5 = vadd.f32 %v500_v4, %v3526_v6  ;;  %v2685_v7 = vpop.f32.mrb[7].mxu1 }
 0x6b0   :  { %v505_v11 = vmul.f32 %v504_v5, %v3548_v16 }
 0x6b2   :  { %3287 = vtanh.f32 %v505_v11 }
 0x6bc   :  { %v3288_v12 = vpop.eup %3287 }
 0x6bd   :  { %v507_v15 = vmul.f32 0.5, %v3288_v12 }
 0x6bf   :  { %v508_v17 = vadd.f32 0.5, %v507_v15 }
 0x6c1   :  { %v509_v18 = vsel %vm3542_vm5, %v3288_v12, %v508_v17 }
 0x6c2   :  { %512 = vrot.lane.b32.xlu0 %v509_v18, %s3403_s25  ;;  %v510_v21 = vmul.f32 %v509_v18, %v415_v57 }
 0x734   :  { %v513_v19 = vpop.permute.xlu0 %512 }
 0x735   :  { %v515_v20 = vmul.f32 %v513_v19, %v509_v18 }
 0x737   :  { %517 = vrot.lane.b32.xlu1 %v515_v20, %s3404_s26 }
 0x7a9   :  { %v518_v22 = vpop.permute.xlu1 %517 }
 0x7aa   :  { %v520_v24 = vadd.f32 %v518_v22, %v510_v21 }
 0x7ac   :  { %3289 = vtanh.f32 %v520_v24 }
 0x7b6   :  { %v3290_v6 = vpop.eup %3289 }
 0x7b7   :  { %523 = vrot.lane.b32.xlu0 %v3290_v6, %s3403_s25 }
 0x829   :  { %v524_v25 = vpop.permute.xlu0 %523 }
 0x82a   :  { %v526_v26 = vmul.f32 %v524_v25, %v509_v18 }
 0x82c   :  { %531 = vrot.lane.b32.xlu0 %v526_v26, %s3403_s25  ;;  %528 = vrot.lane.b32.xlu1 %v526_v26, %s3404_s26 }
 0x89e   :  { %v532_v27 = vpop.permute.xlu0 %531  ;;  %v529_v28 = vpop.permute.xlu1 %528 }
 0x89f   :  { %v534_v29 = vsel %vm323_vm11, %v529_v28, %v532_v27 }
 0x8a0   :  { %v3613_v31 = vmul.f32 %v534_v29, %v3560_v36 }
 0x8a2   :  { %2703 = vmatmul.mubr.msk.f32.vlgmr.msra.gmra.mrb[2].mxu0 %vm99_vm1, %v3613_v31 }
 0x8a3   :  { %3068 = vmatpush3.bf16.msra.mxu0 %v3464_v23  ;;  %2740 = vmatprep.mubr.msk.f32.mxu0 %vm3401_vm0, %v3399_v0 }
 0x8a4   :  { %3069 = vmatprep.subr.bf16.mxu0 %v3400_v1 }
 0x8a7   :  { %3071 = vmatpush3.bf16.msra.mxu0 %v3468_v30 }
 0x8a8   :  { %3072 = vmatprep.subr.bf16.mxu0 %v3400_v1 }
 0x8ab   :  { %3074 = vmatpush3.bf16.msra.mxu0 %v3472_v34 }
 0x8ac   :  { %3075 = vmatprep.subr.bf16.mxu0 %v3400_v1 }
 0x8af   :  { %3077 = vmatpush3.bf16.msra.mxu0 %v3481_v38 }
 0x8b0   :  { %3090 = vmatprep.subr.bf16.mxu0 %v3400_v1 }
 0x975   :  { %v605_v32 = vpop.f32.mrb[2].mxu0 }
 0x976   :  { %v609_v33 = vadd.f32 %v605_v32, %v3540_v13  ;;  %v2704_v35 = vpop.f32.mrb[3].mxu0 }
 0x978   :  { %v610_v37 = vmul.f32 %v609_v33, %v3548_v16 }
 0x97a   :  { %3291 = vtanh.f32 %v610_v37 }
 0x984   :  { %v3292_v39 = vpop.eup %3291 }
 0x985   :  { %v612_v40 = vmul.f32 0.5, %v3292_v39 }
 0x987   :  { %v613_v45 = vadd.f32 0.5, %v612_v40 }
 0x989   :  { %v614_v46 = vsel %vm3542_vm5, %v3292_v39, %v613_v45 }
 0x98a   :  { %617 = vrot.lane.b32.xlu1 %v614_v46, %s3403_s25  ;;  %v615_v49 = vmul.f32 %v614_v46, %v520_v24 }
 0x9fc   :  { %v618_v47 = vpop.permute.xlu1 %617 }
 0x9fd   :  { %v620_v48 = vmul.f32 %v618_v47, %v614_v46  ;;  %v1077_v47 = vrot.slane %v3613_v31, 2 }
 0x9ff   :  { %622 = vrot.lane.b32.xlu0 %v620_v48, %s3404_s26 }
 0xa71   :  { %v623_v50 = vpop.permute.xlu0 %622 }
 0xa72   :  { %v625_v51 = vadd.f32 %v623_v50, %v615_v49 }
 0xa74   :  { %3293 = vtanh.f32 %v625_v51 }
 0xa7e   :  { %v3294_v13 = vpop.eup %3293 }
 0xa7f   :  { %628 = vrot.lane.b32.xlu1 %v3294_v13, %s3403_s25 }
 0xaf1   :  { %v629_v52 = vpop.permute.xlu1 %628 }
 0xaf2   :  { %v631_v53 = vmul.f32 %v629_v52, %v614_v46 }
 0xaf4   :  { %636 = vrot.lane.b32.xlu1 %v631_v53, %s3403_s25  ;;  %633 = vrot.lane.b32.xlu0 %v631_v53, %s3404_s26 }
 0xb66   :  { %v637_v54 = vpop.permute.xlu1 %636  ;;  %v634_v55 = vpop.permute.xlu0 %633 }
 0xb67   :  { %v639_v56 = vsel %vm323_vm11, %v634_v55, %v637_v54 }
 0xb68   :  { %v3638_v57 = vmul.f32 %v639_v56, %v3560_v36 }
 0xb6a   :  { %2722 = vmatmul.mubr.msk.f32.vlgmr.msra.gmra.mrb[8].mxu1 %vm99_vm1, %v3638_v57  ;;  %v1074_v49 = vrot.slane %v3638_v57, 2 }
 0xb6b   :  { %3080 = vmatpush3.bf16.msra.mxu1 %v3464_v23  ;;  %2759 = vmatprep.mubr.msk.f32.mxu1 %vm3401_vm0, %v3399_v0 }
 0xb6c   :  { %3081 = vmatprep.subr.bf16.mxu1 %v3400_v1 }
 0xb6f   :  { %3083 = vmatpush3.bf16.msra.mxu1 %v3468_v30 }
 0xb70   :  { %3084 = vmatprep.subr.bf16.mxu1 %v3400_v1 }
 0xb73   :  { %3086 = vmatpush3.bf16.msra.mxu1 %v3472_v34 }
 0xb74   :  { %3087 = vmatprep.subr.bf16.mxu1 %v3400_v1 }
 0xb77   :  { %3089 = vmatpush3.bf16.msra.mxu1 %v3481_v38 }
 0xc3d   :  { %v710_v58 = vpop.f32.mrb[8].mxu1 }
 0xc3e   :  { %v714_v59 = vadd.f32 %v710_v58, %v3523_v62  ;;  %v2723_v60 = vpop.f32.mrb[9].mxu1 }
 0xc40   :  { %v715_v61 = vmul.f32 %v714_v59, %v3548_v16 }
 0xc42   :  { %3295 = vtanh.f32 %v715_v61 }
 0xc4c   :  { %v3296_v63 = vpop.eup %3295 }
 0xc4d   :  { %v717_v2 = vmul.f32 0.5, %v3296_v63 }
 0xc4f   :  { %v718_v4 = vadd.f32 0.5, %v717_v2 }
 0xc51   :  { %v719_v5 = vsel %vm3542_vm5, %v3296_v63, %v718_v4 }
 0xc52   :  { %722 = vrot.lane.b32.xlu0 %v719_v5, %s3403_s25  ;;  %v720_v12 = vmul.f32 %v719_v5, %v625_v51 }
 0xcc4   :  { %v723_v7 = vpop.permute.xlu0 %722 }
 0xcc5   :  { %v725_v11 = vmul.f32 %v723_v7, %v719_v5 }
 0xcc7   :  { %727 = vrot.lane.b32.xlu1 %v725_v11, %s3404_s26 }
 0xd39   :  { %v728_v15 = vpop.permute.xlu1 %727 }
 0xd3a   :  { %v730_v17 = vadd.f32 %v728_v15, %v720_v12 }
 0xd3c   :  { %3297 = vtanh.f32 %v730_v17 }
 0xd46   :  { %v3298_v62 = vpop.eup %3297 }
 0xd47   :  { %733 = vrot.lane.b32.xlu0 %v3298_v62, %s3403_s25 }
 0xdb9   :  { %v734_v18 = vpop.permute.xlu0 %733 }
 0xdba   :  { %v736_v19 = vmul.f32 %v734_v18, %v719_v5  ;;  %v1080_v18 = vrot.slane %v3588_v3, 2 }
 0xdbc   :  { %741 = vrot.lane.b32.xlu0 %v736_v19, %s3403_s25  ;;  %738 = vrot.lane.b32.xlu1 %v736_v19, %s3404_s26 }
 0xe2e   :  { %v742_v20 = vpop.permute.xlu0 %741  ;;  %v739_v21 = vpop.permute.xlu1 %738 }
 0xe2f   :  { %v744_v22 = vsel %vm323_vm11, %v739_v21, %v742_v20 }
 0xe30   :  { %v3662_v24 = vmul.f32 %v744_v22, %v3560_v36 }
 0xe32   :  { %2741 = vmatmul.mubr.msk.f32.vlgmr.msra.gmra.mrb[4].mxu0 %vm99_vm1, %v3662_v24  ;;  %v1076_v51 = vadd.f32 %v1074_v49, %v3662_v24 }
 0xe33   :  { %3092 = vmatpush3.bf16.msra.mxu0 %v3464_v23  ;;  %2778 = vmatprep.mubr.msk.f32.mxu0 %vm3401_vm0, %v3399_v0 }
 0xe34   :  { %3093 = vmatprep.subr.bf16.mxu0 %v3400_v1 }
 0xe37   :  { %3095 = vmatpush3.bf16.msra.mxu0 %v3468_v30 }
 0xe38   :  { %3096 = vmatprep.subr.bf16.mxu0 %v3400_v1 }
 0xe3b   :  { %3098 = vmatpush3.bf16.msra.mxu0 %v3472_v34 }
 0xe3c   :  { %3099 = vmatprep.subr.bf16.mxu0 %v3400_v1 }
 0xe3f   :  { %3101 = vmatpush3.bf16.msra.mxu0 %v3481_v38 }
 0xe40   :  { %3118 = vmatprep.subr.bf16.mxu0 %v3400_v1 }
 0xf05   :  { %v815_v6 = vpop.f32.mrb[4].mxu0 }
 0xf06   :  { %v819_v23 = vadd.f32 %v815_v6, %v3529_v8  ;;  %v2742_v25 = vpop.f32.mrb[5].mxu0 }
 0xf08   :  { %v820_v26 = vmul.f32 %v819_v23, %v3548_v16 }
 0xf0a   :  { %3299 = vtanh.f32 %v820_v26 }
 0xf14   :  { %v3300_v27 = vpop.eup %3299 }
 0xf15   :  { %v822_v28 = vmul.f32 0.5, %v3300_v27 }
 0xf17   :  { %v823_v30 = vadd.f32 0.5, %v822_v28 }
 0xf19   :  { %v824_v29 = vsel %vm3542_vm5, %v3300_v27, %v823_v30 }
 0xf1a   :  { %827 = vrot.lane.b32.xlu1 %v824_v29, %s3403_s25  ;;  %v825_v38 = vmul.f32 %v824_v29, %v730_v17 }
 0xf8c   :  { %v828_v34 = vpop.permute.xlu1 %827 }
 0xf8d   :  { %v830_v32 = vmul.f32 %v828_v34, %v824_v29 }
 0xf8f   :  { %832 = vrot.lane.b32.xlu0 %v830_v32, %s3404_s26 }
0x1001   :  { %v833_v33 = vpop.permute.xlu0 %832 }
0x1002   :  { %v835_v35 = vadd.f32 %v833_v33, %v825_v38 }
0x1004   :  { %3301 = vtanh.f32 %v835_v35 }
0x100e   :  { %v3302_v8 = vpop.eup %3301 }
0x100f   :  { %838 = vrot.lane.b32.xlu1 %v3302_v8, %s3403_s25  ;;  %v1116_v8 = vld [vmem:[#allocation2 + $0xe0] sm:$0xff] }
0x1081   :  { %v839_v37 = vpop.permute.xlu1 %838 }
0x1082   :  { %v841_v39 = vmul.f32 %v839_v37, %v824_v29  ;;  %v1113_v37 = vld [vmem:[#allocation2 + $0xc0] sm:$0xff] }
0x1084   :  { %846 = vrot.lane.b32.xlu1 %v841_v39, %s3403_s25  ;;  %843 = vrot.lane.b32.xlu0 %v841_v39, %s3404_s26 }
0x10f6   :  { %v847_v40 = vpop.permute.xlu1 %846  ;;  %v844_v45 = vpop.permute.xlu0 %843 }
0x10f7   :  { %v849_v46 = vsel %vm323_vm11, %v844_v45, %v847_v40  ;;  %v1115_v40 = vld [vmem:[#allocation2 + $0xd8] sm:$0xff] }
0x10f8   :  { %v3688_v48 = vmul.f32 %v849_v46, %v3560_v36  ;;  %v1118_v45 = vld [vmem:[#allocation2 + $0xf8] sm:$0xff]  ;;  %v1120_v46 = vld [vmem:[#allocation2 + $0x110] sm:$0xff] }
0x10f9   :  { %v3106_v49 = vpack.c.bf16 %v1120_v46, %v1118_v45 }
0x10fa   :  { %v1079_v50 = vadd.f32 %v1077_v47, %v3688_v48  ;;  %2760 = vmatmul.mubr.msk.f32.vlgmr.msra.gmra.mrb[10].mxu1 %vm99_vm1, %v3688_v48  ;;  %v3104_v47 = vpack.c.bf16 %v1115_v40, %v1113_v37 }
0x10fb   :  { %1220 = vmatprep.mubr.f32.mxu1 %v3399_v0 }
0x10fc   :  { %v1096_v13 = vrot.slane %v1079_v50, 6  ;;  %v1117_v50 = vld [vmem:[#allocation2 + $0xf0] sm:$0xff] }
0x10fe   :  { %v1109_v52 = vsel %vm186_vm2, %v1076_v51, %v1096_v13  ;;  %v1119_v51 = vld [vmem:[#allocation2 + $0x108] sm:$0xff] }
0x10ff   :  { %v3108_v13 = vpack.c.bf16 %v1119_v51, %v1117_v50 }
0x11cd   :  { %v920_v53 = vpop.f32.mrb[10].mxu1 }
0x11ce   :  { %v924_v54 = vadd.f32 %v920_v53, %v3532_v9  ;;  %v2761_v55 = vpop.f32.mrb[11].mxu1  ;;  %v1122_v53 = vld [vmem:[#allocation2 + $0x128] sm:$0xff] }
0x11d0   :  { %v925_v56 = vmul.f32 %v924_v54, %v3548_v16  ;;  %v1124_v54 = vld [vmem:[#allocation2 + $0x140] sm:$0xff] }
0x11d1   :  { %v3110_v55 = vpack.c.bf16 %v1124_v54, %v1122_v53 }
0x11d2   :  { %3303 = vtanh.f32 %v925_v56  ;;  %v1121_v56 = vld [vmem:[#allocation2 + $0x120] sm:$0xff] }
0x11dc   :  { %v3304_v58 = vpop.eup %3303 }
0x11dd   :  { %v927_v59 = vmul.f32 0.5, %v3304_v58 }
0x11df   :  { %v928_v60 = vadd.f32 0.5, %v927_v59 }
0x11e1   :  { %v929_v61 = vsel %vm3542_vm5, %v3304_v58, %v928_v60  ;;  %v1123_v58 = vld [vmem:[#allocation2 + $0x138] sm:$0xff]  ;;  %v1129_v60 = vld [vmem:[#allocation2 + $0xd0] sm:$0xff] }
0x11e2   :  { %932 = vrot.lane.b32.xlu0 %v929_v61, %s3403_s25  ;;  %v930_v4 = vmul.f32 %v929_v61, %v835_v35  ;;  %v3112_v59 = vpack.c.bf16 %v1123_v58, %v1121_v56 }
0x1254   :  { %v933_v63 = vpop.permute.xlu0 %932 }
0x1255   :  { %v935_v2 = vmul.f32 %v933_v63, %v929_v61 }
0x1257   :  { %937 = vrot.lane.b32.xlu1 %v935_v2, %s3404_s26  ;;  %v1126_v2 = vld [vmem:[#allocation2 + $0x158] sm:$0xff] }
0x12c9   :  { %v938_v5 = vpop.permute.xlu1 %937 }
0x12ca   :  { %v940_v7 = vadd.f32 %v938_v5, %v930_v4  ;;  %v1128_v4 = vld [vmem:[#allocation2 + $0x170] sm:$0xff] }
0x12cb   :  { %v3114_v5 = vpack.c.bf16 %v1128_v4, %v1126_v2 }
0x12cc   :  { %3305 = vtanh.f32 %v940_v7 }
0x12d6   :  { %v3306_v9 = vpop.eup %3305 }
0x12d7   :  { %943 = vrot.lane.b32.xlu0 %v3306_v9, %s3403_s25  ;;  %v1127_v9 = vld [vmem:[#allocation2 + $0x168] sm:$0xff] }
0x1349   :  { %v944_v11 = vpop.permute.xlu0 %943 }
0x134a   :  { %v946_v12 = vmul.f32 %v944_v11, %v929_v61  ;;  %v1130_v61 = vld [vmem:[#allocation2 + $0xe8] sm:$0xff] }
0x134b   :  { %v3726_v63 = vpack.c.bf16 %v1130_v61, %v1129_v60 }
0x134c   :  { %951 = vrot.lane.b32.xlu0 %v946_v12, %s3403_s25  ;;  %948 = vrot.lane.b32.xlu1 %v946_v12, %s3404_s26  ;;  %v1131_v12 = vld [vmem:[#allocation2 + $0x100] sm:$0xff] }
0x13be   :  { %v952_v15 = vpop.permute.xlu0 %951  ;;  %v949_v17 = vpop.permute.xlu1 %948 }
0x13bf   :  { %v954_v62 = vsel %vm323_vm11, %v949_v17, %v952_v15  ;;  %v1132_v15 = vld [vmem:[#allocation2 + $0x118] sm:$0xff] }
0x13c0   :  { %v3709_v19 = vmul.f32 %v954_v62, %v3560_v36  ;;  %v3730_v17 = vpack.c.bf16 %v1132_v15, %v1131_v12  ;;  %v1133_v62 = vld [vmem:[#allocation2 + $0x130] sm:$0xff] }
0x13c2   :  { %v1082_v20 = vadd.f32 %v1080_v18, %v3709_v19  ;;  %2779 = vmatmul.mubr.msk.f32.vlgmr.msra.gmra.mrb[6].mxu0 %vm99_vm1, %v3709_v19  ;;  %v1134_v18 = vld [vmem:[#allocation2 + $0x148] sm:$0xff] }
0x13c3   :  { %2797 = vmatprep.mubr.msk.f32.mxu0 %vm3401_vm0, %v3399_v0  ;;  %3120 = vmatpush3.bf16.msra.mxu0 %v3726_v63 }
0x13c4   :  { %v1099_v21 = vrot.slane %v1082_v20, 4  ;;  %3121 = vmatprep.subr.bf16.mxu0 %v3400_v1 }
0x13c6   :  { %v3717_v22 = vsel %vm1105_vm12, %v1109_v52, %v1099_v21  ;;  %v3735_v21 = vpack.c.bf16 %v1134_v18, %v1133_v62 }
0x13c7   :  { %3123 = vmatpush3.bf16.msra.mxu0 %v3730_v17 }
0x13c8   :  { %3124 = vmatprep.subr.bf16.mxu0 %v3400_v1 }
0x13cb   :  { %3126 = vmatpush3.bf16.msra.mxu0 %v3735_v21 }
0x13cc   :  { %3127 = vmatprep.subr.bf16.mxu0 %v3400_v1 }
0x1495   :  { %v1025_v6 = vpop.f32.mrb[6].mxu0 }
0x1496   :  { %v1029_v23 = vadd.f32 %v1025_v6, %v3535_v10  ;;  %v2780_v25 = vpop.f32.mrb[7].mxu0  ;;  %v1114_v10 = vld [vmem:[#allocation2 + $0xc8] sm:$0xff] }
0x1497   :  { %v3102_v39 = vpack.c.bf16 %v1116_v8, %v1114_v10  ;;  %v1136_v25 = vld [vmem:[#allocation2 + $0x178] sm:$0xff]  ;;  %v1083_v8 = vrot.slane %v3564_v43, 2 }
0x1498   :  { %v1030_v26 = vmul.f32 %v1029_v23, %v3548_v16  ;;  %v1135_v23 = vld [vmem:[#allocation2 + $0x160] sm:$0xff] }
0x1499   :  { %3103 = vmatprep.subr.bf16.mxu1 %v3102_v39 }
0x149a   :  { %3307 = vtanh.f32 %v1030_v26  ;;  %3105 = vmatpush1.bf16.msra.mxu1 %v3104_v47  ;;  %v3741_v26 = vpack.c.bf16 %v1136_v25, %v1135_v23 }
0x149b   :  { %3107 = vmatprep.subr.bf16.mxu1 %v3106_v49 }
0x149c   :  { %3129 = vmatpush3.bf16.msra.mxu0 %v3741_v26 }
0x149d   :  { %3142 = vmatprep.subr.bf16.mxu0 %v3400_v1 }
0x149e   :  { %3109 = vmatpush1.bf16.msra.mxu1 %v3108_v13 }
0x149f   :  { %3111 = vmatprep.subr.bf16.mxu1 %v3110_v55  ;;  %2798 = vmatmul.mubr.f32.vlgmr.msra.gmra.mrb[8].mxu0 %v3399_v0 }
0x14a0   :  { %3144 = vmatpush3.bf16.msra.mxu0 %v3726_v63  ;;  %2835 = vmatprep.mubr.msk.f32.mxu0 %vm3401_vm0, %v3399_v0 }
0x14a1   :  { %3145 = vmatprep.subr.bf16.mxu0 %v3400_v1 }
0x14a2   :  { %3113 = vmatpush1.bf16.msra.mxu1 %v3112_v59 }
0x14a3   :  { %3115 = vmatprep.subr.bf16.mxu1 %v3114_v5 }
0x14a4   :  { %v3308_v27 = vpop.eup %3307  ;;  %3147 = vmatpush3.bf16.msra.mxu0 %v3730_v17 }
0x14a5   :  { %v1032_v28 = vmul.f32 0.5, %v3308_v27  ;;  %3148 = vmatprep.subr.bf16.mxu0 %v3400_v1 }
0x14a7   :  { %v1033_v30 = vadd.f32 0.5, %v1032_v28  ;;  %v1068_v28 = vrot.slane %v3688_v48, 2 }
0x14a8   :  { %3150 = vmatpush3.bf16.msra.mxu0 %v3735_v21 }
0x14a9   :  { %v1034_v29 = vsel %vm3542_vm5, %v3308_v27, %v1033_v30  ;;  %3151 = vmatprep.subr.bf16.mxu0 %v3400_v1  ;;  %v1065_v27 = vrot.slane %v3709_v19, 2  ;;  %v1071_v30 = vrot.slane %v3662_v24, 2 }
0x14aa   :  { %1037 = vrot.lane.b32.xlu1 %v1034_v29, %s3403_s25  ;;  %v1035_v38 = vmul.f32 %v1034_v29, %v940_v7  ;;  %v1125_v7 = vld [vmem:[#allocation2 + $0x150] sm:$0xff] }
0x14ab   :  { %v3116_v11 = vpack.c.bf16 %v1127_v9, %v1125_v7  ;;  %v1073_v10 = vadd.f32 %v1071_v30, %v3638_v57 }
0x14ac   :  { %3153 = vmatpush3.bf16.msra.mxu0 %v3741_v26 }
0x14ad   :  { %3117 = vmatpush1.bf16.msra.mxu1 %v3116_v11  ;;  %3166 = vmatprep.subr.bf16.mxu0 %v3400_v1  ;;  %v1093_v40 = vrot.slane %v1073_v10, 2 }
0x14ae   :  { %3130 = vmatprep.subr.bf16.mxu1 %v3400_v1 }
0x151c   :  { %v1038_v34 = vpop.permute.xlu1 %1037 }
0x151d   :  { %v1040_v32 = vmul.f32 %v1038_v34, %v1034_v29 }
0x151f   :  { %1042 = vrot.lane.b32.xlu0 %v1040_v32, %s3404_s26 }
0x1591   :  { %v1043_v33 = vpop.permute.xlu0 %1042 }
0x1592   :  { %v1045_v35 = vadd.f32 %v1043_v33, %v1035_v38  ;;  %v1067_v38 = vadd.f32 %v1065_v27, %v3588_v3 }
0x1594   :  { %3309 = vtanh.f32 %v1045_v35  ;;  %v1070_v35 = vadd.f32 %v1068_v28, %v3613_v31  ;;  %v1087_v19 = vrot.slane %v1067_v38, 6  ;;  %v1335_v31 = vpop.f32.mrb[8].mxu0 }
0x1595   :  { %v2799_v57 = vpop.f32.mrb[9].mxu0 }
0x1596   :  { %v1090_v24 = vrot.slane %v1070_v35, 4 }
0x159e   :  { %v3310_v52 = vpop.eup %3309 }
0x159f   :  { %1048 = vrot.lane.b32.xlu1 %v3310_v52, %s3403_s25 }
0x1611   :  { %v1049_v20 = vpop.permute.xlu1 %1048 }
0x1612   :  { %v1051_v6 = vmul.f32 %v1049_v20, %v1034_v29 }
0x1614   :  { %1056 = vrot.lane.b32.xlu1 %v1051_v6, %s3403_s25  ;;  %1053 = vrot.lane.b32.xlu0 %v1051_v6, %s3404_s26 }
0x1686   :  { %v1057_v29 = vpop.permute.xlu1 %1056  ;;  %v1054_v34 = vpop.permute.xlu0 %1053 }
0x1687   :  { %v1059_v32 = vsel %vm323_vm11, %v1054_v34, %v1057_v29 }
0x1688   :  { %v1060_v33 = vmul.f32 %v1059_v32, %v3560_v36 }
0x168a   :  { %v1062_v37 = vrot.slane %v1060_v33, 2  ;;  %v1085_v39 = vadd.f32 %v1083_v8, %v1060_v33 }
0x168c   :  { %v1064_v48 = vadd.f32 %v1062_v37, %v3564_v43  ;;  %v1102_v3 = vrot.slane %v1085_v39, 2 }
0x168e   :  { %v1104_v45 = vsel %vm186_vm2, %v1064_v48, %v1087_v19  ;;  %v3778_v43 = vsel %vm1107_vm13, %v3717_v22, %v1102_v3  ;;  %v2438_v22 = vld [vmem:[%s4027_s2 + $0x2] sm:$0x3] }
0x168f   :  { %v1106_v46 = vsel %vm1105_vm12, %v1104_v45, %v1090_v24  ;;  %v1143_v49 = vrot.slane %v2438_v22, %v91_v42  ;;  %v1147_v50 = vrot.slane %v2438_v22, %v95_v44 }
0x1690   :  { %v3769_v47 = vsel %vm1107_vm13, %v1106_v46, %v1093_v40 }
0x1691   :  { %2439 = vmatmul.mubr.msk.f32.vlgmr.msra.gmra.mrb[12].mxu1 %vm99_vm1, %v3769_v47 }
0x1692   :  { %1226 = vmatprep.mubr.f32.mxu1 %v3399_v0  ;;  %3132 = vmatpush3.bf16.msra.mxu1 %v3726_v63 }
0x1693   :  { %3133 = vmatprep.subr.bf16.mxu1 %v3400_v1 }
0x1695   :  { %2440 = vmatmul.mubr.msk.f32.gmra.mrb[14].mxu1 %vm99_vm1, %v3778_v43 }
0x1696   :  { %3135 = vmatpush3.bf16.msra.mxu1 %v3730_v17  ;;  %2816 = vmatprep.mubr.msk.f32.mxu1 %vm3401_vm0, %v3399_v0 }
0x1697   :  { %3136 = vmatprep.subr.bf16.mxu1 %v3400_v1 }
0x169a   :  { %3138 = vmatpush3.bf16.msra.mxu1 %v3735_v21 }
0x169b   :  { %3139 = vmatprep.subr.bf16.mxu1 %v3400_v1 }
0x169e   :  { %3141 = vmatpush3.bf16.msra.mxu1 %v3741_v26 }
0x169f   :  { %3154 = vmatprep.subr.bf16.mxu1 %v3400_v1 }
0x1764   :  { %v1222_v51 = vpop.f32.mrb[12].mxu1 }
0x1765   :  { %v1223_v13 = vadd.f32 %v1222_v51, %v1143_v49  ;;  %v1224_v52 = vpop.f32.mrb[13].mxu1 }
0x1766   :  { %v1225_v53 = vadd.f32 %v1224_v52, %v1147_v50 }
0x1767   :  { %v1238_v59 = vrot.slane %v1223_v13, 2  ;;  %v1243_v60 = vrot.slane %v1223_v13, 4  ;;  %v1246_v2 = vrot.slane %v1223_v13, 6 }
0x1768   :  { %v1228_v54 = vpop.f32.mrb[14].mxu1  ;;  %v1252_v55 = vrot.slane %v1225_v53, 4  ;;  %v1258_v4 = vrot.slane %v1225_v53, 2  ;;  %v1266_v5 = vrot.slane %v1225_v53, 6 }
0x1769   :  { %v1229_v56 = vadd.f32 %v1228_v54, %v1143_v49  ;;  %v1230_v58 = vpop.f32.mrb[15].mxu1 }
0x176a   :  { %v1231_v61 = vadd.f32 %v1230_v58, %v1147_v50 }
0x176b   :  { %v3798_v7 = vsel %vm186_vm2, %v1229_v56, %v1252_v55  ;;  %v1256_v42 = vrot.slane %v1229_v56, 2  ;;  %v1261_v41 = vrot.slane %v1229_v56, 4  ;;  %v1264_v44 = vrot.slane %v1229_v56, 6 }
0x176c   :  { %v1234_v9 = vrot.slane %v1231_v61, 4  ;;  %v1240_v11 = vrot.slane %v1231_v61, 2  ;;  %v3801_v12 = vsel %vm186_vm2, %v1243_v60, %v1231_v61  ;;  %v1248_v15 = vrot.slane %v1231_v61, 6 }
0x176d   :  { %v3804_v62 = vsel %vm186_vm2, %v1256_v42, %v1258_v4  ;;  %v3807_v18 = vsel %vm186_vm2, %v1261_v41, %v1225_v53  ;;  %v3810_v20 = vsel %vm186_vm2, %v1264_v44, %v1266_v5 }
0x176e   :  { %v1236_v6 = vsel %vm186_vm2, %v1223_v13, %v1234_v9  ;;  %v1242_v23 = vsel %vm186_vm2, %v1238_v59, %v1240_v11  ;;  %v3815_v25 = vsel %vm186_vm2, %v1246_v2, %v1248_v15 }
0x176f   :  { %v1339_v27 = vadd.f32 %v1335_v31, %v1236_v6 }
0x1771   :  { %v1340_v28 = vmul.f32 %v1339_v27, %v3548_v16 }
0x1773   :  { %3311 = vtanh.f32 %v1340_v28 }
0x177d   :  { %v3312_v30 = vpop.eup %3311 }
0x177e   :  { %v1342_v29 = vmul.f32 0.5, %v3312_v30 }
0x1780   :  { %v1343_v34 = vadd.f32 0.5, %v1342_v29 }
0x1782   :  { %v1344_v32 = vsel %vm3542_vm5, %v3312_v30, %v1343_v34 }
0x1783   :  { %1347 = vrot.lane.b32.xlu0 %v1344_v32, %s3403_s25  ;;  %v1345_v35 = vmul.f32 0.0, %v1344_v32 }
0x17f5   :  { %v1348_v38 = vpop.permute.xlu0 %1347 }
0x17f6   :  { %v1350_v33 = vmul.f32 %v1348_v38, %v1344_v32 }
0x17f8   :  { %1352 = vrot.lane.b32.xlu1 %v1350_v33, %s3404_s26 }
0x186a   :  { %v1353_v10 = vpop.permute.xlu1 %1352 }
0x186b   :  { %v1355_v8 = vadd.f32 %v1353_v10, %v1345_v35 }
0x186d   :  { %3313 = vtanh.f32 %v1355_v8 }
0x1877   :  { %v3314_v37 = vpop.eup %3313 }
0x1878   :  { %1358 = vrot.lane.b32.xlu0 %v3314_v37, %s3403_s25 }
0x18ea   :  { %v1359_v19 = vpop.permute.xlu0 %1358 }
0x18eb   :  { %v1361_v48 = vmul.f32 %v1359_v19, %v1344_v32 }
0x18ed   :  { %1366 = vrot.lane.b32.xlu0 %v1361_v48, %s3403_s25  ;;  %1363 = vrot.lane.b32.xlu1 %v1361_v48, %s3404_s26 }
0x195f   :  { %v1367_v39 = vpop.permute.xlu0 %1366  ;;  %v1364_v24 = vpop.permute.xlu1 %1363 }
0x1960   :  { %v1369_v40 = vsel %vm323_vm11, %v1364_v24, %v1367_v39 }
0x1961   :  { %v3827_v45 = vmul.f32 %v1369_v40, %v3560_v36 }
0x1963   :  { %2817 = vmatmul.mubr.msk.f32.vlgmr.msra.gmra.mrb[16].mxu1 %vm99_vm1, %v3827_v45 }
0x1964   :  { %3156 = vmatpush3.bf16.msra.mxu1 %v3726_v63  ;;  %2854 = vmatprep.mubr.msk.f32.mxu1 %vm3401_vm0, %v3399_v0 }
0x1965   :  { %3157 = vmatprep.subr.bf16.mxu1 %v3400_v1 }
0x1968   :  { %3159 = vmatpush3.bf16.msra.mxu1 %v3730_v17 }
0x1969   :  { %3160 = vmatprep.subr.bf16.mxu1 %v3400_v1 }
0x196c   :  { %3162 = vmatpush3.bf16.msra.mxu1 %v3735_v21 }
0x196d   :  { %3163 = vmatprep.subr.bf16.mxu1 %v3400_v1 }
0x1970   :  { %3165 = vmatpush3.bf16.msra.mxu1 %v3741_v26 }
0x1971   :  { %3178 = vmatprep.subr.bf16.mxu1 %v3400_v1 }
0x1a36   :  { %v1440_v46 = vpop.f32.mrb[16].mxu1 }
0x1a37   :  { %v1444_v3 = vadd.f32 %v1440_v46, %v1242_v23  ;;  %v2818_v31 = vpop.f32.mrb[17].mxu1 }
0x1a39   :  { %v1445_v57 = vmul.f32 %v1444_v3, %v3548_v16 }
0x1a3b   :  { %3315 = vtanh.f32 %v1445_v57 }
0x1a45   :  { %v3316_v22 = vpop.eup %3315 }
0x1a46   :  { %v1447_v49 = vmul.f32 0.5, %v3316_v22 }
0x1a48   :  { %v1448_v50 = vadd.f32 0.5, %v1447_v49 }
0x1a4a   :  { %v1449_v51 = vsel %vm3542_vm5, %v3316_v22, %v1448_v50 }
0x1a4b   :  { %1452 = vrot.lane.b32.xlu1 %v1449_v51, %s3403_s25  ;;  %v1450_v53 = vmul.f32 %v1449_v51, %v1355_v8 }
0x1abd   :  { %v1453_v13 = vpop.permute.xlu1 %1452 }
0x1abe   :  { %v1455_v52 = vmul.f32 %v1453_v13, %v1449_v51 }
0x1ac0   :  { %1457 = vrot.lane.b32.xlu0 %v1455_v52, %s3404_s26 }
0x1b32   :  { %v1458_v54 = vpop.permute.xlu0 %1457 }
0x1b33   :  { %v1460_v55 = vadd.f32 %v1458_v54, %v1450_v53 }
0x1b35   :  { %3317 = vtanh.f32 %v1460_v55 }
0x1b3f   :  { %v3318_v56 = vpop.eup %3317 }
0x1b40   :  { %1463 = vrot.lane.b32.xlu1 %v3318_v56, %s3403_s25 }
0x1bb2   :  { %v1464_v58 = vpop.permute.xlu1 %1463 }
0x1bb3   :  { %v1466_v59 = vmul.f32 %v1464_v58, %v1449_v51 }
0x1bb5   :  { %1471 = vrot.lane.b32.xlu1 %v1466_v59, %s3403_s25  ;;  %1468 = vrot.lane.b32.xlu0 %v1466_v59, %s3404_s26 }
0x1c27   :  { %v1472_v60 = vpop.permute.xlu1 %1471  ;;  %v1469_v61 = vpop.permute.xlu0 %1468 }
0x1c28   :  { %v1474_v2 = vsel %vm323_vm11, %v1469_v61, %v1472_v60 }
0x1c29   :  { %v3851_v4 = vmul.f32 %v1474_v2, %v3560_v36 }
0x1c2b   :  { %2836 = vmatmul.mubr.msk.f32.vlgmr.msra.gmra.mrb[10].mxu0 %vm99_vm1, %v3851_v4 }
0x1c2c   :  { %3168 = vmatpush3.bf16.msra.mxu0 %v3726_v63  ;;  %2873 = vmatprep.mubr.msk.f32.mxu0 %vm3401_vm0, %v3399_v0 }
0x1c2d   :  { %3169 = vmatprep.subr.bf16.mxu0 %v3400_v1 }
0x1c30   :  { %3171 = vmatpush3.bf16.msra.mxu0 %v3730_v17 }
0x1c31   :  { %3172 = vmatprep.subr.bf16.mxu0 %v3400_v1 }
0x1c34   :  { %3174 = vmatpush3.bf16.msra.mxu0 %v3735_v21 }
0x1c35   :  { %3175 = vmatprep.subr.bf16.mxu0 %v3400_v1 }
0x1c38   :  { %3177 = vmatpush3.bf16.msra.mxu0 %v3741_v26 }
0x1c39   :  { %3190 = vmatprep.subr.bf16.mxu0 %v3400_v1 }
0x1cfe   :  { %v1545_v5 = vpop.f32.mrb[10].mxu0 }
0x1cff   :  { %v1549_v42 = vadd.f32 %v1545_v5, %v3801_v12  ;;  %v2837_v41 = vpop.f32.mrb[11].mxu0 }
0x1d01   :  { %v1550_v44 = vmul.f32 %v1549_v42, %v3548_v16 }
0x1d03   :  { %3319 = vtanh.f32 %v1550_v44 }
0x1d0d   :  { %v3320_v9 = vpop.eup %3319 }
0x1d0e   :  { %v1552_v11 = vmul.f32 0.5, %v3320_v9 }
0x1d10   :  { %v1553_v15 = vadd.f32 0.5, %v1552_v11 }
0x1d12   :  { %v1554_v6 = vsel %vm3542_vm5, %v3320_v9, %v1553_v15 }
0x1d13   :  { %1557 = vrot.lane.b32.xlu0 %v1554_v6, %s3403_s25  ;;  %v1555_v28 = vmul.f32 %v1554_v6, %v1460_v55 }
0x1d85   :  { %v1558_v23 = vpop.permute.xlu0 %1557 }
0x1d86   :  { %v1560_v27 = vmul.f32 %v1558_v23, %v1554_v6 }
0x1d88   :  { %1562 = vrot.lane.b32.xlu1 %v1560_v27, %s3404_s26 }
0x1dfa   :  { %v1563_v30 = vpop.permute.xlu1 %1562 }
0x1dfb   :  { %v1565_v29 = vadd.f32 %v1563_v30, %v1555_v28 }
0x1dfd   :  { %3321 = vtanh.f32 %v1565_v29 }
0x1e07   :  { %v3322_v12 = vpop.eup %3321 }
0x1e08   :  { %1568 = vrot.lane.b32.xlu0 %v3322_v12, %s3403_s25 }
0x1e7a   :  { %v1569_v34 = vpop.permute.xlu0 %1568 }
0x1e7b   :  { %v1571_v32 = vmul.f32 %v1569_v34, %v1554_v6 }
0x1e7d   :  { %1576 = vrot.lane.b32.xlu0 %v1571_v32, %s3403_s25  ;;  %1573 = vrot.lane.b32.xlu1 %v1571_v32, %s3404_s26 }
0x1eef   :  { %v1577_v38 = vpop.permute.xlu0 %1576  ;;  %v1574_v33 = vpop.permute.xlu1 %1573 }
0x1ef0   :  { %v1579_v35 = vsel %vm323_vm11, %v1574_v33, %v1577_v38 }
0x1ef1   :  { %v3876_v10 = vmul.f32 %v1579_v35, %v3560_v36 }
0x1ef3   :  { %2855 = vmatmul.mubr.msk.f32.vlgmr.msra.gmra.mrb[18].mxu1 %vm99_vm1, %v3876_v10 }
0x1ef4   :  { %3180 = vmatpush3.bf16.msra.mxu1 %v3726_v63  ;;  %2892 = vmatprep.mubr.msk.f32.mxu1 %vm3401_vm0, %v3399_v0 }
0x1ef5   :  { %3181 = vmatprep.subr.bf16.mxu1 %v3400_v1 }
0x1ef8   :  { %3183 = vmatpush3.bf16.msra.mxu1 %v3730_v17 }
0x1ef9   :  { %3184 = vmatprep.subr.bf16.mxu1 %v3400_v1 }
0x1efc   :  { %3186 = vmatpush3.bf16.msra.mxu1 %v3735_v21 }
0x1efd   :  { %3187 = vmatprep.subr.bf16.mxu1 %v3400_v1 }
0x1f00   :  { %3189 = vmatpush3.bf16.msra.mxu1 %v3741_v26 }
0x1f01   :  { %3202 = vmatprep.subr.bf16.mxu1 %v3400_v1 }
0x1fc6   :  { %v1650_v8 = vpop.f32.mrb[18].mxu1 }
0x1fc7   :  { %v1654_v37 = vadd.f32 %v1650_v8, %v3815_v25  ;;  %v2856_v19 = vpop.f32.mrb[19].mxu1  ;;  %v2163_v8 = vld [vmem:[#allocation4 + $0x40] sm:$0xff] }
0x1fc9   :  { %v1655_v48 = vmul.f32 %v1654_v37, %v3548_v16  ;;  %v2164_v37 = vld [vmem:[#allocation4 + $0x48] sm:$0xff] }
0x1fca   :  { %v3214_v19 = vpack.c.bf16 %v2164_v37, %v2163_v8 }
0x1fcb   :  { %3323 = vtanh.f32 %v1655_v48 }
0x1fd5   :  { %v3324_v39 = vpop.eup %3323 }
0x1fd6   :  { %v1657_v24 = vmul.f32 0.5, %v3324_v39 }
0x1fd8   :  { %v1658_v40 = vadd.f32 0.5, %v1657_v24  ;;  %v2165_v24 = vld [vmem:[#allocation4 + $0x50] sm:$0xff] }
0x1fda   :  { %v1659_v46 = vsel %vm3542_vm5, %v3324_v39, %v1658_v40  ;;  %v2166_v40 = vld [vmem:[#allocation4 + $0x58] sm:$0xff] }
0x1fdb   :  { %1662 = vrot.lane.b32.xlu1 %v1659_v46, %s3403_s25  ;;  %v1660_v57 = vmul.f32 %v1659_v46, %v1565_v29 }
0x204d   :  { %v1663_v3 = vpop.permute.xlu1 %1662 }
0x204e   :  { %v1665_v31 = vmul.f32 %v1663_v3, %v1659_v46 }
0x2050   :  { %1667 = vrot.lane.b32.xlu0 %v1665_v31, %s3404_s26 }
0x20c2   :  { %v1668_v22 = vpop.permute.xlu0 %1667 }
0x20c3   :  { %v1670_v49 = vadd.f32 %v1668_v22, %v1660_v57  ;;  %v2122_v57 = vrot.slane %v3876_v10, 2 }
0x20c5   :  { %3325 = vtanh.f32 %v1670_v49 }
0x20cf   :  { %v3326_v25 = vpop.eup %3325 }
0x20d0   :  { %1673 = vrot.lane.b32.xlu1 %v3326_v25, %s3403_s25  ;;  %v2167_v25 = vld [vmem:[#allocation4 + $0x60] sm:$0xff] }
0x2142   :  { %v1674_v50 = vpop.permute.xlu1 %1673 }
0x2143   :  { %v1676_v51 = vmul.f32 %v1674_v50, %v1659_v46  ;;  %v2168_v50 = vld [vmem:[#allocation4 + $0x68] sm:$0xff] }
0x2145   :  { %1681 = vrot.lane.b32.xlu1 %v1676_v51, %s3403_s25  ;;  %1678 = vrot.lane.b32.xlu0 %v1676_v51, %s3404_s26 }
0x21b7   :  { %v1682_v13 = vpop.permute.xlu1 %1681  ;;  %v1679_v52 = vpop.permute.xlu0 %1678 }
0x21b8   :  { %v1684_v53 = vsel %vm323_vm11, %v1679_v52, %v1682_v13 }
0x21b9   :  { %v3901_v54 = vmul.f32 %v1684_v53, %v3560_v36 }
0x21bb   :  { %2874 = vmatmul.mubr.msk.f32.vlgmr.msra.gmra.mrb[12].mxu0 %vm99_vm1, %v3901_v54  ;;  %v2119_v51 = vrot.slane %v3901_v54, 2 }
0x21bc   :  { %3192 = vmatpush3.bf16.msra.mxu0 %v3726_v63  ;;  %2911 = vmatprep.mubr.msk.f32.mxu0 %vm3401_vm0, %v3399_v0 }
0x21bd   :  { %3193 = vmatprep.subr.bf16.mxu0 %v3400_v1 }
0x21c0   :  { %3195 = vmatpush3.bf16.msra.mxu0 %v3730_v17 }
0x21c1   :  { %3196 = vmatprep.subr.bf16.mxu0 %v3400_v1 }
0x21c4   :  { %3198 = vmatpush3.bf16.msra.mxu0 %v3735_v21 }
0x21c5   :  { %3199 = vmatprep.subr.bf16.mxu0 %v3400_v1 }
0x21c8   :  { %3201 = vmatpush3.bf16.msra.mxu0 %v3741_v26 }
0x21c9   :  { %3215 = vmatprep.subr.bf16.mxu0 %v3214_v19 }
0x228e   :  { %v1755_v55 = vpop.f32.mrb[12].mxu0 }
0x228f   :  { %v1759_v56 = vadd.f32 %v1755_v55, %v3798_v7  ;;  %v2875_v58 = vpop.f32.mrb[13].mxu0  ;;  %v3222_v55 = vpack.c.bf16 %v2168_v50, %v2167_v25  ;;  %v2160_v25 = vld [vmem:[#allocation4 + $0x28] sm:$0xff]  ;;  %v2161_v50 = vld [vmem:[#allocation4 + $0x30] sm:$0xff] }
0x2290   :  { %v2170_v58 = vld [vmem:[#allocation4 + $0x78] sm:$0xff] }
0x2291   :  { %v1760_v59 = vmul.f32 %v1759_v56, %v3548_v16  ;;  %v2169_v56 = vld [vmem:[#allocation4 + $0x70] sm:$0xff] }
0x2293   :  { %3327 = vtanh.f32 %v1760_v59 }
0x229d   :  { %v3328_v60 = vpop.eup %3327 }
0x229e   :  { %v1762_v61 = vmul.f32 0.5, %v3328_v60 }
0x22a0   :  { %v1763_v2 = vadd.f32 0.5, %v1762_v61 }
0x22a2   :  { %v1764_v5 = vsel %vm3542_vm5, %v3328_v60, %v1763_v2  ;;  %v3226_v60 = vpack.c.bf16 %v2170_v58, %v2169_v56  ;;  %v2323_v58 = vld [vmem:[#allocation4 + $0x90] sm:$0xff] }
0x22a3   :  { %1767 = vrot.lane.b32.xlu0 %v1764_v5, %s3403_s25  ;;  %v1765_v44 = vmul.f32 %v1764_v5, %v1670_v49  ;;  %v3218_v49 = vpack.c.bf16 %v2166_v40, %v2165_v24 }
0x2315   :  { %v1768_v42 = vpop.permute.xlu0 %1767 }
0x2316   :  { %v1770_v41 = vmul.f32 %v1768_v42, %v1764_v5 }
0x2318   :  { %1772 = vrot.lane.b32.xlu1 %v1770_v41, %s3404_s26 }
0x238a   :  { %v1773_v9 = vpop.permute.xlu1 %1772 }
0x238b   :  { %v1775_v11 = vadd.f32 %v1773_v9, %v1765_v44 }
0x238d   :  { %3329 = vtanh.f32 %v1775_v11 }
0x2397   :  { %v3330_v7 = vpop.eup %3329 }
0x2398   :  { %1778 = vrot.lane.b32.xlu0 %v3330_v7, %s3403_s25 }
0x240a   :  { %v1779_v15 = vpop.permute.xlu0 %1778 }
0x240b   :  { %v1781_v6 = vmul.f32 %v1779_v15, %v1764_v5 }
0x240d   :  { %1786 = vrot.lane.b32.xlu0 %v1781_v6, %s3403_s25  ;;  %1783 = vrot.lane.b32.xlu1 %v1781_v6, %s3404_s26 }
0x247f   :  { %v1787_v23 = vpop.permute.xlu0 %1786  ;;  %v1784_v27 = vpop.permute.xlu1 %1783 }
0x2480   :  { %v1789_v28 = vsel %vm323_vm11, %v1784_v27, %v1787_v23 }
0x2481   :  { %v3925_v30 = vmul.f32 %v1789_v28, %v3560_v36 }
0x2483   :  { %2893 = vmatmul.mubr.msk.f32.vlgmr.msra.gmra.mrb[20].mxu1 %vm99_vm1, %v3925_v30  ;;  %v2121_v52 = vadd.f32 %v2119_v51, %v3925_v30  ;;  %v2162_v51 = vld [vmem:[#allocation4 + $0x38] sm:$0xff] }
0x2484   :  { %3204 = vmatpush3.bf16.msra.mxu1 %v3726_v63  ;;  %2930 = vmatprep.mubr.msk.f32.mxu1 %vm3401_vm0, %v3399_v0 }
0x2485   :  { %3205 = vmatprep.subr.bf16.mxu1 %v3400_v1 }
0x2488   :  { %3207 = vmatpush3.bf16.msra.mxu1 %v3730_v17 }
0x2489   :  { %3208 = vmatprep.subr.bf16.mxu1 %v3400_v1 }
0x248c   :  { %3210 = vmatpush3.bf16.msra.mxu1 %v3735_v21 }
0x248d   :  { %3211 = vmatprep.subr.bf16.mxu1 %v3400_v1 }
0x2490   :  { %3213 = vmatpush3.bf16.msra.mxu1 %v3741_v26 }
0x2556   :  { %v1860_v29 = vpop.f32.mrb[20].mxu1 }
0x2557   :  { %v1864_v12 = vadd.f32 %v1860_v29, %v3804_v62  ;;  %v2894_v34 = vpop.f32.mrb[21].mxu1 }
0x2559   :  { %v1865_v63 = vmul.f32 %v1864_v12, %v3548_v16 }
0x255b   :  { %3331 = vtanh.f32 %v1865_v63  ;;  %v2125_v63 = vrot.slane %v3851_v4, 2 }
0x2565   :  { %v3332_v0 = vpop.eup %3331 }
0x2566   :  { %v1867_v32 = vmul.f32 0.5, %v3332_v0 }
0x2568   :  { %v1868_v38 = vadd.f32 0.5, %v1867_v32 }
0x256a   :  { %v1869_v17 = vsel %vm3542_vm5, %v3332_v0, %v1868_v38 }
0x256b   :  { %1872 = vrot.lane.b32.xlu1 %v1869_v17, %s3403_s25  ;;  %v1870_v1 = vmul.f32 %v1869_v17, %v1775_v11 }
0x25dd   :  { %v1873_v21 = vpop.permute.xlu1 %1872 }
0x25de   :  { %v1875_v33 = vmul.f32 %v1873_v21, %v1869_v17 }
0x25e0   :  { %1877 = vrot.lane.b32.xlu0 %v1875_v33, %s3404_s26 }
0x2652   :  { %v1878_v26 = vpop.permute.xlu0 %1877 }
0x2653   :  { %v1880_v35 = vadd.f32 %v1878_v26, %v1870_v1 }
0x2655   :  { %3333 = vtanh.f32 %v1880_v35 }
0x265f   :  { %v3334_v62 = vpop.eup %3333 }
0x2660   :  { %1883 = vrot.lane.b32.xlu1 %v3334_v62, %s3403_s25 }
0x26d2   :  { %v1884_v48 = vpop.permute.xlu1 %1883 }
0x26d3   :  { %v1886_v39 = vmul.f32 %v1884_v48, %v1869_v17 }
0x26d5   :  { %1891 = vrot.lane.b32.xlu1 %v1886_v39, %s3403_s25  ;;  %1888 = vrot.lane.b32.xlu0 %v1886_v39, %s3404_s26 }
0x2747   :  { %v1892_v46 = vpop.permute.xlu1 %1891  ;;  %v1889_v3 = vpop.permute.xlu0 %1888 }
0x2748   :  { %v1894_v31 = vsel %vm323_vm11, %v1889_v3, %v1892_v46  ;;  %v2156_v46 = vld [vmem:[#allocation4 + $0x8] sm:$0xff] }
0x2749   :  { %v3950_v22 = vmul.f32 %v1894_v31, %v3560_v36  ;;  %v2158_v31 = vld [vmem:[#allocation4 + $0x18] sm:$0xff] }
0x274b   :  { %v2124_v13 = vadd.f32 %v2122_v57, %v3950_v22  ;;  %2912 = vmatmul.mubr.msk.f32.vlgmr.msra.gmra.mrb[14].mxu0 %vm99_vm1, %v3950_v22 }
0x274c   :  { %3217 = vmatpush3.bf16.msra.mxu0 %v3214_v19  ;;  %2949 = vmatprep.mubr.msk.f32.mxu0 %vm99_vm1, %v3769_v47  ;;  %v3343_v47 = vld [vmem:[%s4025_s0] sm:$0xff] }
0x274d   :  { %v2141_v53 = vrot.slane %v2124_v13, 6  ;;  %3219 = vmatprep.subr.bf16.mxu0 %v3218_v49  ;;  %v3242_v13 = vpack.c.bf16 %v2162_v51, %v2161_v50 }
0x274f   :  { %v2152_v59 = vsel %vm186_vm2, %v2121_v52, %v2141_v53  ;;  %v2321_v53 = vld [vmem:[#allocation4 + $0x80] sm:$0xff] }
0x2750   :  { %3221 = vmatpush3.bf16.msra.mxu0 %v3218_v49  ;;  %v2159_v49 = vld [vmem:[#allocation4 + $0x20] sm:$0xff] }
0x2751   :  { %3223 = vmatprep.subr.bf16.mxu0 %v3222_v55  ;;  %v3238_v14 = vpack.c.bf16 %v2160_v25, %v2159_v49 }
0x2754   :  { %3225 = vmatpush3.bf16.msra.mxu0 %v3222_v55  ;;  %v2322_v55 = vld [vmem:[#allocation4 + $0x88] sm:$0xff] }
0x2755   :  { %3227 = vmatprep.subr.bf16.mxu0 %v3226_v60  ;;  %v3246_v56 = vpack.c.bf16 %v2322_v55, %v2321_v53 }
0x2758   :  { %3229 = vmatpush3.bf16.msra.mxu0 %v3226_v60 }
0x275b   :  { %2950 = vmatmul.mubr.msk.f32.vlgmr.msra.gmra.mrb[16].mxu0 %vm99_vm1, %v3778_v43 }
0x275c   :  { %2968 = vmatprep.mubr.msk.f32.mxu0 %vm99_vm1, %v3343_v47  ;;  %v3344_v47 = vld [vmem:[%s4025_s0 + $0x8] sm:$0xff] }
0x281e   :  { %v1965_v61 = vpop.f32.mrb[14].mxu0 }
0x281f   :  { %v1969_v2 = vadd.f32 %v1965_v61, %v3807_v18  ;;  %v2913_v5 = vpop.f32.mrb[15].mxu0  ;;  %v2325_v61 = vld [vmem:[#allocation4 + $0xa0] sm:$0xff] }
0x2821   :  { %v1970_v42 = vmul.f32 %v1969_v2, %v3548_v16  ;;  %v2326_v2 = vld [vmem:[#allocation4 + $0xa8] sm:$0xff] }
0x2822   :  { %v3254_v5 = vpack.c.bf16 %v2326_v2, %v2325_v61 }
0x2823   :  { %3335 = vtanh.f32 %v1970_v42  ;;  %v2327_v42 = vld [vmem:[#allocation4 + $0xb0] sm:$0xff] }
0x282d   :  { %v3336_v41 = vpop.eup %3335 }
0x282e   :  { %v1972_v44 = vmul.f32 0.5, %v3336_v41 }
0x2830   :  { %v1973_v9 = vadd.f32 0.5, %v1972_v44 }
0x2832   :  { %v1974_v11 = vsel %vm3542_vm5, %v3336_v41, %v1973_v9  ;;  %v2328_v41 = vld [vmem:[#allocation4 + $0xb8] sm:$0xff] }
0x2833   :  { %1977 = vrot.lane.b32.xlu0 %v1974_v11, %s3403_s25  ;;  %v1975_v15 = vmul.f32 %v1974_v11, %v1880_v35  ;;  %v3258_v44 = vpack.c.bf16 %v2328_v41, %v2327_v42 }
0x28a5   :  { %v1978_v43 = vpop.permute.xlu0 %1977 }
0x28a6   :  { %v1980_v7 = vmul.f32 %v1978_v43, %v1974_v11 }
0x28a8   :  { %1982 = vrot.lane.b32.xlu1 %v1980_v7, %s3404_s26  ;;  %v2113_v7 = vrot.slane %v3950_v22, 2 }
0x291a   :  { %v1983_v6 = vpop.permute.xlu1 %1982 }
0x291b   :  { %v1985_v23 = vadd.f32 %v1983_v6, %v1975_v15  ;;  %v2116_v15 = vrot.slane %v3925_v30, 2 }
0x291d   :  { %3337 = vtanh.f32 %v1985_v23 }
0x2927   :  { %v3338_v18 = vpop.eup %3337 }
0x2928   :  { %1988 = vrot.lane.b32.xlu0 %v3338_v18, %s3403_s25 }
0x299a   :  { %v1989_v27 = vpop.permute.xlu0 %1988 }
0x299b   :  { %v1991_v28 = vmul.f32 %v1989_v27, %v1974_v11 }
0x299d   :  { %1996 = vrot.lane.b32.xlu0 %v1991_v28, %s3403_s25  ;;  %1993 = vrot.lane.b32.xlu1 %v1991_v28, %s3404_s26  ;;  %v2128_v28 = vrot.slane %v3827_v45, 2 }
0x2a0f   :  { %v1997_v29 = vpop.permute.xlu0 %1996  ;;  %v1994_v12 = vpop.permute.xlu1 %1993 }
0x2a10   :  { %v1999_v34 = vsel %vm323_vm11, %v1994_v12, %v1997_v29  ;;  %v2115_v12 = vadd.f32 %v2113_v7, %v3876_v10 }
0x2a11   :  { %v3978_v0 = vmul.f32 %v1999_v34, %v3560_v36 }
0x2a12   :  { %v2135_v30 = vrot.slane %v2115_v12, 4 }
0x2a13   :  { %v2127_v32 = vadd.f32 %v2125_v63, %v3978_v0  ;;  %2931 = vmatmul.mubr.msk.f32.vlgmr.msra.gmra.mrb[22].mxu1 %vm99_vm1, %v3978_v0  ;;  %v2110_v43 = vrot.slane %v3978_v0, 2  ;;  %v2118_v0 = vadd.f32 %v2116_v15, %v3901_v54 }
0x2a15   :  { %v2144_v38 = vrot.slane %v2127_v32, 4  ;;  %v2112_v27 = vadd.f32 %v2110_v43, %v3851_v4 }
0x2a17   :  { %v3984_v17 = vsel %vm1105_vm12, %v2152_v59, %v2144_v38  ;;  %v2324_v59 = vld [vmem:[#allocation4 + $0x98] sm:$0xff]  ;;  %v2132_v32 = vrot.slane %v2112_v27, 6 }
0x2a18   :  { %v3250_v60 = vpack.c.bf16 %v2324_v59, %v2323_v58 }
0x2ae6   :  { %v2070_v21 = vpop.f32.mrb[22].mxu1 }
0x2ae7   :  { %v2074_v33 = vadd.f32 %v2070_v21, %v3810_v20  ;;  %v2932_v1 = vpop.f32.mrb[23].mxu1  ;;  %v2155_v20 = vld [vmem:[#allocation4] sm:$0xff]  ;;  %v2138_v21 = vrot.slane %v2118_v0, 2 }
0x2ae8   :  { %v3230_v3 = vpack.c.bf16 %v2156_v46, %v2155_v20 }
0x2ae9   :  { %v2075_v26 = vmul.f32 %v2074_v33, %v3548_v16  ;;  %v2157_v16 = vld [vmem:[#allocation4 + $0x10] sm:$0xff] }
0x2aea   :  { %v3234_v57 = vpack.c.bf16 %v2158_v31, %v2157_v16  ;;  %3231 = vmatprep.subr.bf16.mxu0 %v3230_v3 }
0x2aeb   :  { %3339 = vtanh.f32 %v2075_v26  ;;  %3233 = vmatpush3.bf16.msra.mxu0 %v3230_v3 }
0x2aec   :  { %3235 = vmatprep.subr.bf16.mxu0 %v3234_v57 }
0x2aef   :  { %3237 = vmatpush3.bf16.msra.mxu0 %v3234_v57 }
0x2af0   :  { %3239 = vmatprep.subr.bf16.mxu0 %v3238_v14 }
0x2af3   :  { %3241 = vmatpush3.bf16.msra.mxu0 %v3238_v14 }
0x2af4   :  { %3243 = vmatprep.subr.bf16.mxu0 %v3242_v13 }
0x2af5   :  { %v3340_v35 = vpop.eup %3339 }
0x2af6   :  { %v2077_v62 = vmul.f32 0.5, %v3340_v35 }
0x2af7   :  { %3245 = vmatpush3.bf16.msra.mxu0 %v3242_v13 }
0x2af8   :  { %v2078_v8 = vadd.f32 0.5, %v2077_v62  ;;  %3247 = vmatprep.subr.bf16.mxu0 %v3246_v56 }
0x2afa   :  { %v2079_v37 = vsel %vm3542_vm5, %v3340_v35, %v2078_v8  ;;  %2969 = vmatmul.mubr.msk.f32.vlgmr.msra.gmra.mrb[16].mxu0 %vm99_vm1, %v3344_v47 }
0x2afb   :  { %2082 = vrot.lane.b32.xlu1 %v2079_v37, %s3403_s25  ;;  %v2080_v39 = vmul.f32 %v2079_v37, %v1985_v23  ;;  %3249 = vmatpush3.bf16.msra.mxu0 %v3246_v56 }
0x2afc   :  { %3251 = vmatprep.subr.bf16.mxu0 %v3250_v60 }
0x2aff   :  { %3253 = vmatpush3.bf16.msra.mxu0 %v3250_v60 }
0x2b00   :  { %3255 = vmatprep.subr.bf16.mxu0 %v3254_v5 }
0x2b03   :  { %3257 = vmatpush3.bf16.msra.mxu0 %v3254_v5 }
0x2b04   :  { %3259 = vmatprep.subr.bf16.mxu0 %v3258_v44 }
0x2b07   :  { %3261 = vmatpush3.bf16.msra.mxu0 %v3258_v44 }
0x2b6d   :  { %v2083_v19 = vpop.permute.xlu1 %2082 }
0x2b6e   :  { %v2085_v48 = vmul.f32 %v2083_v19, %v2079_v37 }
0x2b70   :  { %2087 = vrot.lane.b32.xlu0 %v2085_v48, %s3404_s26 }
0x2be2   :  { %v2088_v24 = vpop.permute.xlu0 %2087 }
0x2be3   :  { %v2090_v40 = vadd.f32 %v2088_v24, %v2080_v39 }
0x2be5   :  { %3341 = vtanh.f32 %v2090_v40 }
0x2bef   :  { %v3342_v52 = vpop.eup %3341 }
0x2bf0   :  { %2093 = vrot.lane.b32.xlu1 %v3342_v52, %s3403_s25 }
0x2c62   :  { %v2094_v9 = vpop.permute.xlu1 %2093 }
0x2c63   :  { %v2096_v11 = vmul.f32 %v2094_v9, %v2079_v37 }
0x2c65   :  { %2101 = vrot.lane.b32.xlu1 %v2096_v11, %s3403_s25  ;;  %2098 = vrot.lane.b32.xlu0 %v2096_v11, %s3404_s26 }
0x2cd7   :  { %v2102_v6 = vpop.permute.xlu1 %2101  ;;  %v2099_v23 = vpop.permute.xlu0 %2098 }
0x2cd8   :  { %v2104_v18 = vsel %vm323_vm11, %v2099_v23, %v2102_v6 }
0x2cd9   :  { %v2105_v29 = vmul.f32 %v2104_v18, %v3560_v36 }
0x2cdb   :  { %v2107_v34 = vrot.slane %v2105_v29, 2  ;;  %v2130_v63 = vadd.f32 %v2128_v28, %v2105_v29 }
0x2cdd   :  { %v2109_v22 = vadd.f32 %v2107_v34, %v3827_v45  ;;  %v2147_v38 = vrot.slane %v2130_v63, 2  ;;  %v2454_v45 = vld [vmem:[%s4029_s4] ss:$0 sm:$0xff] }
0x2cdf   :  { %v2149_v33 = vsel %vm186_vm2, %v2109_v22, %v2132_v32  ;;  %v2154_v36 = vsel %vm1107_vm13, %v3984_v17, %v2147_v38 }
0x2ce0   :  { %v2150_v4 = vsel %vm1105_vm12, %v2149_v33, %v2135_v30 }
0x2ce1   :  { %v2151_v1 = vsel %vm1107_vm13, %v2150_v4, %v2138_v21 }
0x2ce2   :  { %2987 = vmatprep.mubr.msk.f32.mxu0 %vm99_vm1, %v2151_v1 }
0x2ce3   :  { %2988 = vmatmul.mubr.msk.f32.vlgmr.msra.gmra.mrb[16].mxu0 %vm99_vm1, %v2154_v36 }
0x2db6   :  { %v2989_v10 = vpop.f32.mrb[16].mxu0 }
0x2db7   :  { %v2420_v54 = vadd.f32 %v2989_v10, %v2454_v45  ;;  %v2401_v26 = vpop.f32.mrb[17].mxu0 }
0x2db8   :  { %v2419_v35 = vadd.f32 %v2454_v45, %v2401_v26 }
0x2db9   :  { %2422 = vst [vmem:[%s4030_s5 + $0x8] sm:$0xff] %v2420_v54 }
0x2dba   :  { %2421 = vst [vmem:[%s4030_s5] sm:$0xff] %v2419_v35 }
0x2dbb   :  { %2427 = vsyncpa [#allocation3], 1 }
0x2dbc   :  { %2428 = vsyncpa [#allocation5], 1 }

</bundles_post_ra>
